<compile_context>
chip_gen: v7x
topology: tpu7x:2x2x1
jax: 0.10.0
libtpu: 0.0.40
codegen_flags: <defaults>
</compile_context>

<pallas_src>
import functools

import jax
import jax.numpy as jnp
from jax.experimental import pallas as pl
from jax.experimental.pallas import tpu as pltpu

LANE = 128
SUBLANE = 8


def _round_up(v, m):
    return (v + m - 1) // m * m


def _vmem_limit_bytes():
    """Scoped-VMEM request: half of physical VMEM, clamped to [32, 64] MiB.

    v5e/v6e (128 MiB physical) -> 64 MiB (well above v5e's 16 MiB scoped
    default); v7x (64 MiB physical per TC) -> 32 MiB (its scoped default)."""
    cap = 128 << 20
    try:
        cap = int(getattr(pltpu.get_tpu_info(), "vmem_capacity_bytes", cap))
    except Exception:
        pass
    return int(min(max(cap // 2, 32 << 20), 64 << 20))


def _pick_batch_tile(B, L_ext, T, C, max_k, n_k, f_pad, o_pad, x_bytes, w_bytes,
                     budget_bytes):
    """Largest mult-of-8 batch tile whose real VMEM footprint fits the budget.

    Counts: double-buffered x/out tiles, 2x resident weights (default pipeline
    buffer count), f32 upcast of the x tile, im2col parts + concat result, the
    matmul-dtype im2col operand, z, per-branch activation temporaries, pooled
    features."""
    kC = max_k * C
    nF = n_k * f_pad
    per_row = (2 * L_ext * C * x_bytes     # x tile (double-buffered by BlockSpec)
               + L_ext * C * 4             # f32 upcast of the x tile
               + 2 * T * kC * 4            # im2col parts + concat result (f32)
               + T * kC * x_bytes          # im2col operand in matmul dtype
               + T * nF * 4                # z: f32 conv outputs for all branches
               + 2 * T * f_pad * 4         # per-branch y + mask temporaries
               + nF * 8                    # pooled features (f32 + matmul dtype)
               + 2 * o_pad * 4)            # out tile (double-buffered)
    fixed = (2 * (kC * nF + nF * o_pad) * w_bytes            # wk, fcw (2 bufs each)
             + 2 * (SUBLANE * f_pad + SUBLANE * o_pad) * 4)  # conv/fc biases
    avail = max(budget_bytes - fixed, SUBLANE * per_row)
    bt = max(SUBLANE, min(1024, avail // per_row))
    bt = (bt // SUBLANE) * SUBLANE
    b_full = _round_up(B, SUBLANE)
    bt = min(bt, b_full)
    # Keep >= 2 grid steps when possible so the "parallel" batch axis can shard
    # across both v7x TensorCores and the pipeline has something to overlap.
    if b_full >= 2 * SUBLANE:
        bt = min(bt, _round_up((b_full + 1) // 2, SUBLANE))
    return int(max(bt, SUBLANE))


def _text_dgcnn_kernel(kernel_sizes, seq_len, t_steps, f_pad, matmul_dtype,
                       x_ref, wk_ref, b_ref, fcw_ref, fcb_ref, o_ref):
    """Fused im2col-in-K conv (all branches) -> relu -> max+mean pool -> fc."""
    bt, _, c = x_ref.shape
    max_k = max(kernel_sizes)
    n_k = len(kernel_sizes)
    kC = max_k * c

    # --- im2col in the contraction dim --------------------------------------
    # Upcast once to f32 so the sublane-offset window slices and the minor-dim
    # concat stay on the 32-bit relayout path; cast back right before the dot.
    x = x_ref[...].astype(jnp.float32)                       # (bt, L_ext, C)
    parts = [x[:, j:j + t_steps, :] for j in range(max_k)]   # (bt, T, C) windows
    xw = parts[0] if max_k == 1 else jnp.concatenate(parts, axis=-1)
    xw = xw.reshape(bt * t_steps, kC).astype(matmul_dtype)   # (bt*T, max_k*C)

    # One MXU contraction for every branch: K = max_k*C, N = n_k*f_pad.
    z = jnp.dot(xw, wk_ref[...], preferred_element_type=jnp.float32)
    z = z.reshape(bt, t_steps, n_k * f_pad)

    b_all = b_ref[...]                                       # (n_k, f_pad) f32
    t_idx = jax.lax.broadcasted_iota(jnp.int32, (1, t_steps, 1), 1)

    # --- per-branch bias + relu + masked max/mean pooling --------------------
    pooled_parts = []
    for i, k in enumerate(kernel_sizes):
        l_out = seq_len - k + 1                              # 'valid' conv length
        y = z[:, :, i * f_pad:(i + 1) * f_pad] + b_all[i:i + 1, :][None]
        y = jnp.maximum(y, 0.0)                              # relu (>= 0)
        y = jnp.where(t_idx < l_out, y, 0.0)                 # mask padded time rows
        # relu output is >= 0, so masking invalid rows to 0 keeps max correct;
        # mean uses the masked sum with the true static 1/l_out.
        pooled = jnp.max(y, axis=1) + jnp.sum(y, axis=1) * (1.0 / l_out)
        pooled_parts.append(pooled)                          # (bt, f_pad)

    # Lane-aligned concat (f_pad is a multiple of 128) -> one FC matmul.
    pooled_all = (pooled_parts[0] if n_k == 1
                  else jnp.concatenate(pooled_parts, axis=-1))  # (bt, n_k*f_pad)
    out = jnp.dot(pooled_all.astype(matmul_dtype), fcw_ref[...],
                  preferred_element_type=jnp.float32) + fcb_ref[...]
    o_ref[...] = out.astype(o_ref.dtype)


def text_dgcnn_forward(x, conv_ws, conv_bs, fc_w, fc_b, kernel_sizes,
                       *, matmul_dtype=jnp.bfloat16):
    """x: (B, L, C) f32. conv_ws[i]: (k_i, C, F). fc_w: (n_k*F, O). Returns (B, O) f32.

    Accuracy-sensitive callers should pass matmul_dtype=jnp.float32 (bit-close
    path); the default bf16 operands use f32 accumulation.
    """
    kernel_sizes = tuple(int(k) for k in kernel_sizes)
    B, L, C = x.shape
    F = conv_ws[0].shape[-1]
    O = fc_w.shape[1]
    n_k = len(kernel_sizes)
    max_k = max(kernel_sizes)
    assert L >= max_k, "sequence length must be >= max kernel size (valid conv)"

    f_pad = _round_up(F, LANE)
    o_pad = _round_up(O, LANE)
    kC = max_k * C

    # Time-step count computed per branch-shared matmul, and extended input
    # length, both padded to multiples of 8 so reshapes are layout no-ops.
    T = _round_up(L, SUBLANE)
    L_ext = _round_up(T + max_k - 1, SUBLANE)

    x_bytes = jnp.dtype(matmul_dtype).itemsize
    w_bytes = x_bytes

    # ---- merged, lane-padded weights (host-side, once) ------------------------
    # TODO(synk): when F << 128, several taps' true-F filter columns could share
    # one 128-lane group (aligned with pltpu.roll) instead of padding each branch
    # to f_pad; kept simple here since it is a no-op for production-sized F.
    w_k = jnp.zeros((kC, n_k * f_pad), jnp.float32)
    for i, (k, w) in enumerate(zip(kernel_sizes, conv_ws)):       # w: (k, C, F)
        for j in range(k):
            w_k = w_k.at[j * C:(j + 1) * C, i * f_pad:i * f_pad + F].set(w[j])

    b_all = jnp.zeros((n_k, f_pad), jnp.float32)
    for i, b in enumerate(conv_bs):
        b_all = b_all.at[i, :F].set(b)

    fcw_all = jnp.zeros((n_k * f_pad, o_pad), jnp.float32)
    for i in range(n_k):
        fcw_all = fcw_all.at[i * f_pad:i * f_pad + F, :O].set(fc_w[i * F:(i + 1) * F, :])
    fcb_pad = jnp.zeros((1, o_pad), jnp.float32).at[0, :O].set(fc_b)

    w_k = w_k.astype(matmul_dtype)
    fcw_all = fcw_all.astype(matmul_dtype)

    # ---- batch tiling & VMEM sizing --------------------------------------------
    vmem_limit = _vmem_limit_bytes()
    budget = (vmem_limit * 3) // 4          # leave headroom under the scoped limit
    b_tile = _pick_batch_tile(B, L_ext, T, C, max_k, n_k, f_pad, o_pad,
                              x_bytes, w_bytes, budget)
    b_padded = _round_up(B, b_tile)

    # Wrapper-side cast (halves x DMA + x tile VMEM) and time/batch zero-padding.
    x_c = x.astype(matmul_dtype)
    x_ext = jnp.pad(x_c, ((0, b_padded - B), (0, L_ext - L), (0, 0)))

    # TODO(synk): for very long sequences, additionally tile over T with a
    # (max_k - 1) halo and grid-carried running max/sum scratch; here the full
    # (tiled-batch, T) slab fits VMEM so time is kept whole per grid step.

    kernel = functools.partial(_text_dgcnn_kernel, kernel_sizes, L, T, f_pad,
                               matmul_dtype)

    # Note: the constant-index weight inputs could be single-buffered with
    # pipeline_mode=pl.Buffered(1); they are instead accounted for twice in the
    # VMEM budget above, which is safe on every generation.
    out_pad = pl.pallas_call(
        kernel,
        out_shape=jax.ShapeDtypeStruct((b_padded, o_pad), jnp.float32),
        grid_spec=pltpu.PrefetchScalarGridSpec(
            num_scalar_prefetch=0,
            grid=(b_padded // b_tile,),
            in_specs=[
                pl.BlockSpec((b_tile, L_ext, C), lambda b: (b, 0, 0)),     # x tile
                pl.BlockSpec((kC, n_k * f_pad), lambda b: (0, 0)),         # conv W (im2col-K)
                pl.BlockSpec((n_k, f_pad), lambda b: (0, 0)),              # conv biases
                pl.BlockSpec((n_k * f_pad, o_pad), lambda b: (0, 0)),      # fc weight
                pl.BlockSpec((1, o_pad), lambda b: (0, 0)),                # fc bias
            ],
            out_specs=pl.BlockSpec((b_tile, o_pad), lambda b: (b, 0)),
        ),
        compiler_params=pltpu.CompilerParams(
            dimension_semantics=("parallel",),
            vmem_limit_bytes=vmem_limit,
        ),
    )(x_ext, w_k, b_all, fcw_all, fcb_pad)

    return out_pad[:B, :O]


def _reference_forward(x, conv_ws, conv_bs, fc_w, fc_b, kernel_sizes):
    """Pure-JAX reference mirroring the PyTorch module (NCW conv path)."""
    xt = jnp.transpose(x, (0, 2, 1))                 # (B, C, L), as after permute(0,2,1)
    x0, x1 = [], []
    for w, b in zip(conv_ws, conv_bs):
        rhs = jnp.transpose(w, (2, 1, 0))            # (F, C, k) ~ torch Conv1d weight
        y = jax.lax.conv_general_dilated(
            xt, rhs, window_strides=(1,), padding='VALID',
            dimension_numbers=('NCH', 'OIH', 'NCH'))
        y = jnp.maximum(y + b[None, :, None], 0.0)   # (B, F, L_out)
        x0.append(jnp.max(y, axis=2))
        x1.append(jnp.mean(y, axis=2))
    feat = jnp.concatenate(x0, axis=1) + jnp.concatenate(x1, axis=1)
    return feat @ fc_w + fc_b[None, :]


if __name__ == "__main__":
    # Small deterministic config: batch=2, seq=16, input_dim=32,
    # kernel_sizes=(2,3,4), num_filters=16, output_dim=8.
    B, L, input_dim = 2, 16, 32
    kernel_sizes = (2, 3, 4)
    num_filters = 16
    output_dim = 8

    key = jax.random.PRNGKey(0)
    keys = jax.random.split(key, 2 * len(kernel_sizes) + 3)

    x = jax.random.normal(keys[0], (B, L, input_dim), dtype=jnp.float32)

    conv_ws, conv_bs = [], []
    for i, k in enumerate(kernel_sizes):
        conv_ws.append(0.1 * jax.random.normal(
            keys[1 + 2 * i], (k, input_dim, num_filters), dtype=jnp.float32))
        conv_bs.append(0.1 * jax.random.normal(
            keys[2 + 2 * i], (num_filters,), dtype=jnp.float32))

    fc_in = len(kernel_sizes) * num_filters
    fc_w = 0.1 * jax.random.normal(keys[-2], (fc_in, output_dim), dtype=jnp.float32)
    fc_b = 0.1 * jax.random.normal(keys[-1], (output_dim,), dtype=jnp.float32)

    ref = _reference_forward(x, conv_ws, conv_bs, fc_w, fc_b, kernel_sizes)

    # f32 MXU operands: tight tolerance.
    out_f32 = jax.block_until_ready(
        text_dgcnn_forward(x, conv_ws, conv_bs, fc_w, fc_b, kernel_sizes,
                           matmul_dtype=jnp.float32))
    assert out_f32.shape == (B, output_dim)
    assert jnp.allclose(out_f32, ref, atol=1e-4, rtol=1e-4)

    # bf16 MXU operands (fast path on v6e/v7x), f32 accumulation: looser tolerance.
    out_bf16 = jax.block_until_ready(
        text_dgcnn_forward(x, conv_ws, conv_bs, fc_w, fc_b, kernel_sizes,
                           matmul_dtype=jnp.bfloat16))
    assert out_bf16.shape == (B, output_dim)
    assert jnp.allclose(out_bf16, ref, atol=5e-2, rtol=5e-2)

    print("KERNEL_OK")
</pallas_src>

<mosaic_0001>
module attributes {stable_mosaic.version = 11 : i64} {
  func.func @_text_dgcnn_kernel(%arg0: i32, %arg1: memref<8x24x32xf32, #tpu.memory_space<vmem>>, %arg2: memref<128x384xf32, #tpu.memory_space<vmem>>, %arg3: memref<3x128xf32, #tpu.memory_space<vmem>>, %arg4: memref<384x128xf32, #tpu.memory_space<vmem>>, %arg5: memref<1x128xf32, #tpu.memory_space<vmem>>, %arg6: memref<8x128xf32, #tpu.memory_space<vmem>>) attributes {dimension_semantics = [#tpu.dimension_semantics<parallel>], iteration_bounds = array<i64: 1>, scalar_prefetch = 0 : i64, scratch_operands = 0 : i64, tpu.core_type = #tpu.core_type<tc>, window_params = [{transform_indices = @transform_0, window_bounds = array<i64: 8, 24, 32>}, {pipeline_mode = #tpu.pipeline_mode<synchronous>, transform_indices = @transform_1, window_bounds = array<i64: 128, 384>}, {pipeline_mode = #tpu.pipeline_mode<synchronous>, transform_indices = @transform_2, window_bounds = array<i64: 3, 128>}, {pipeline_mode = #tpu.pipeline_mode<synchronous>, transform_indices = @transform_3, window_bounds = array<i64: 384, 128>}, {pipeline_mode = #tpu.pipeline_mode<synchronous>, transform_indices = @transform_4, window_bounds = array<i64: 1, 128>}, {transform_indices = @transform_5, window_bounds = array<i64: 8, 128>}]} {
    %c0 = arith.constant 0 : index
    %c0_0 = arith.constant 0 : index
    %c0_1 = arith.constant 0 : index
    %0 = vector.load %arg1[%c0, %c0_0, %c0_1] : memref<8x24x32xf32, #tpu.memory_space<vmem>>, vector<8x24x32xf32>
    %1 = vector.extract_strided_slice %0 {offsets = [0, 0, 0], sizes = [8, 16, 32], strides = [1, 1, 1]} : vector<8x24x32xf32> to vector<8x16x32xf32>
    %2 = vector.extract_strided_slice %0 {offsets = [0, 1, 0], sizes = [8, 16, 32], strides = [1, 1, 1]} : vector<8x24x32xf32> to vector<8x16x32xf32>
    %3 = vector.extract_strided_slice %0 {offsets = [0, 2, 0], sizes = [8, 16, 32], strides = [1, 1, 1]} : vector<8x24x32xf32> to vector<8x16x32xf32>
    %4 = vector.extract_strided_slice %0 {offsets = [0, 3, 0], sizes = [8, 16, 32], strides = [1, 1, 1]} : vector<8x24x32xf32> to vector<8x16x32xf32>
    %5 = tpu.concatenate %1, %2, %3, %4 in 2 : vector<8x16x32xf32>, vector<8x16x32xf32>, vector<8x16x32xf32>, vector<8x16x32xf32> -> vector<8x16x128xf32>
    %6 = vector.shape_cast %5 : vector<8x16x128xf32> to vector<128x128xf32>
    %c0_2 = arith.constant 0 : index
    %c0_3 = arith.constant 0 : index
    %7 = vector.load %arg2[%c0_2, %c0_3] : memref<128x384xf32, #tpu.memory_space<vmem>>, vector<128x384xf32>
    %cst = arith.constant dense<0.000000e+00> : vector<128x384xf32>
    %8 = tpu.matmul %6, %7, %cst {dimension_numbers = #tpu.dot_dimension_numbers<[1], [0], [0], [1], [0, 0, 1, 1], [], []>} : vector<128x128xf32>, vector<128x384xf32>, vector<128x384xf32> -> vector<128x384xf32>
    %9 = vector.shape_cast %8 : vector<128x384xf32> to vector<8x16x384xf32>
    %c0_4 = arith.constant 0 : index
    %c0_5 = arith.constant 0 : index
    %10 = vector.load %arg3[%c0_4, %c0_5] : memref<3x128xf32, #tpu.memory_space<vmem>>, vector<3x128xf32>
    %11 = tpu.iota {dimensions = array<i32: 1>} : vector<1x16x1xi32>
    %12 = vector.extract_strided_slice %9 {offsets = [0, 0, 0], sizes = [8, 16, 128], strides = [1, 1, 1]} : vector<8x16x384xf32> to vector<8x16x128xf32>
    %13 = vector.extract_strided_slice %10 {offsets = [0, 0], sizes = [1, 128], strides = [1, 1]} : vector<3x128xf32> to vector<1x128xf32>
    %14 = vector.shape_cast %13 : vector<1x128xf32> to vector<1x1x128xf32>
    %15 = vector.broadcast %14 : vector<1x1x128xf32> to vector<8x16x128xf32>
    %16 = arith.addf %12, %15 : vector<8x16x128xf32>
    %cst_6 = arith.constant 0.000000e+00 : f32
    %17 = vector.broadcast %cst_6 : f32 to vector<8x16x128xf32>
    %18 = arith.maximumf %16, %17 : vector<8x16x128xf32>
    %c15_i32 = arith.constant 15 : i32
    %19 = vector.broadcast %c15_i32 : i32 to vector<1x16x1xi32>
    %20 = arith.cmpi slt, %11, %19 : vector<1x16x1xi32>
    %cst_7 = arith.constant 0.000000e+00 : f32
    %21 = vector.shape_cast %20 : vector<1x16x1xi1> to vector<1x16x1xi1>
    %22 = vector.broadcast %21 : vector<1x16x1xi1> to vector<8x16x128xi1>
    %23 = vector.broadcast %cst_7 : f32 to vector<8x16x128xf32>
    %24 = arith.select %22, %18, %23 : vector<8x16x128xi1>, vector<8x16x128xf32>
    %cst_8 = arith.constant dense<0xFF800000> : vector<8x128xf32>
    %25 = vector.multi_reduction <maximumf>, %24, %cst_8 [1] : vector<8x16x128xf32> to vector<8x128xf32>
    %cst_9 = arith.constant dense<0.000000e+00> : vector<8x128xf32>
    %26 = vector.multi_reduction <add>, %24, %cst_9 [1] : vector<8x16x128xf32> to vector<8x128xf32>
    %cst_10 = arith.constant 0.0666666701 : f32
    %27 = vector.broadcast %cst_10 : f32 to vector<8x128xf32>
    %28 = arith.mulf %26, %27 : vector<8x128xf32>
    %29 = arith.addf %25, %28 : vector<8x128xf32>
    %30 = vector.extract_strided_slice %9 {offsets = [0, 0, 128], sizes = [8, 16, 128], strides = [1, 1, 1]} : vector<8x16x384xf32> to vector<8x16x128xf32>
    %31 = vector.extract_strided_slice %10 {offsets = [1, 0], sizes = [1, 128], strides = [1, 1]} : vector<3x128xf32> to vector<1x128xf32>
    %32 = vector.shape_cast %31 : vector<1x128xf32> to vector<1x1x128xf32>
    %33 = vector.broadcast %32 : vector<1x1x128xf32> to vector<8x16x128xf32>
    %34 = arith.addf %30, %33 : vector<8x16x128xf32>
    %cst_11 = arith.constant 0.000000e+00 : f32
    %35 = vector.broadcast %cst_11 : f32 to vector<8x16x128xf32>
    %36 = arith.maximumf %34, %35 : vector<8x16x128xf32>
    %c14_i32 = arith.constant 14 : i32
    %37 = vector.broadcast %c14_i32 : i32 to vector<1x16x1xi32>
    %38 = arith.cmpi slt, %11, %37 : vector<1x16x1xi32>
    %cst_12 = arith.constant 0.000000e+00 : f32
    %39 = vector.shape_cast %38 : vector<1x16x1xi1> to vector<1x16x1xi1>
    %40 = vector.broadcast %39 : vector<1x16x1xi1> to vector<8x16x128xi1>
    %41 = vector.broadcast %cst_12 : f32 to vector<8x16x128xf32>
    %42 = arith.select %40, %36, %41 : vector<8x16x128xi1>, vector<8x16x128xf32>
    %cst_13 = arith.constant dense<0xFF800000> : vector<8x128xf32>
    %43 = vector.multi_reduction <maximumf>, %42, %cst_13 [1] : vector<8x16x128xf32> to vector<8x128xf32>
    %cst_14 = arith.constant dense<0.000000e+00> : vector<8x128xf32>
    %44 = vector.multi_reduction <add>, %42, %cst_14 [1] : vector<8x16x128xf32> to vector<8x128xf32>
    %cst_15 = arith.constant 0.0714285746 : f32
    %45 = vector.broadcast %cst_15 : f32 to vector<8x128xf32>
    %46 = arith.mulf %44, %45 : vector<8x128xf32>
    %47 = arith.addf %43, %46 : vector<8x128xf32>
    %48 = vector.extract_strided_slice %9 {offsets = [0, 0, 256], sizes = [8, 16, 128], strides = [1, 1, 1]} : vector<8x16x384xf32> to vector<8x16x128xf32>
    %49 = vector.extract_strided_slice %10 {offsets = [2, 0], sizes = [1, 128], strides = [1, 1]} : vector<3x128xf32> to vector<1x128xf32>
    %50 = vector.shape_cast %49 : vector<1x128xf32> to vector<1x1x128xf32>
    %51 = vector.broadcast %50 : vector<1x1x128xf32> to vector<8x16x128xf32>
    %52 = arith.addf %48, %51 : vector<8x16x128xf32>
    %cst_16 = arith.constant 0.000000e+00 : f32
    %53 = vector.broadcast %cst_16 : f32 to vector<8x16x128xf32>
    %54 = arith.maximumf %52, %53 : vector<8x16x128xf32>
    %c13_i32 = arith.constant 13 : i32
    %55 = vector.broadcast %c13_i32 : i32 to vector<1x16x1xi32>
    %56 = arith.cmpi slt, %11, %55 : vector<1x16x1xi32>
    %cst_17 = arith.constant 0.000000e+00 : f32
    %57 = vector.shape_cast %56 : vector<1x16x1xi1> to vector<1x16x1xi1>
    %58 = vector.broadcast %57 : vector<1x16x1xi1> to vector<8x16x128xi1>
    %59 = vector.broadcast %cst_17 : f32 to vector<8x16x128xf32>
    %60 = arith.select %58, %54, %59 : vector<8x16x128xi1>, vector<8x16x128xf32>
    %cst_18 = arith.constant dense<0xFF800000> : vector<8x128xf32>
    %61 = vector.multi_reduction <maximumf>, %60, %cst_18 [1] : vector<8x16x128xf32> to vector<8x128xf32>
    %cst_19 = arith.constant dense<0.000000e+00> : vector<8x128xf32>
    %62 = vector.multi_reduction <add>, %60, %cst_19 [1] : vector<8x16x128xf32> to vector<8x128xf32>
    %cst_20 = arith.constant 0.0769230798 : f32
    %63 = vector.broadcast %cst_20 : f32 to vector<8x128xf32>
    %64 = arith.mulf %62, %63 : vector<8x128xf32>
    %65 = arith.addf %61, %64 : vector<8x128xf32>
    %66 = tpu.concatenate %29, %47, %65 in 1 : vector<8x128xf32>, vector<8x128xf32>, vector<8x128xf32> -> vector<8x384xf32>
    %c0_21 = arith.constant 0 : index
    %c0_22 = arith.constant 0 : index
    %67 = vector.load %arg4[%c0_21, %c0_22] : memref<384x128xf32, #tpu.memory_space<vmem>>, vector<384x128xf32>
    %cst_23 = arith.constant dense<0.000000e+00> : vector<8x128xf32>
    %68 = tpu.matmul %66, %67, %cst_23 {dimension_numbers = #tpu.dot_dimension_numbers<[1], [0], [0], [1], [0, 0, 1, 1], [], []>} : vector<8x384xf32>, vector<384x128xf32>, vector<8x128xf32> -> vector<8x128xf32>
    %c0_24 = arith.constant 0 : index
    %c0_25 = arith.constant 0 : index
    %69 = vector.load %arg5[%c0_24, %c0_25] : memref<1x128xf32, #tpu.memory_space<vmem>>, vector<1x128xf32>
    %70 = vector.broadcast %69 : vector<1x128xf32> to vector<8x128xf32>
    %71 = arith.addf %68, %70 : vector<8x128xf32>
    %c0_26 = arith.constant 0 : index
    %c0_27 = arith.constant 0 : index
    %72 = vector.load %arg6[%c0_26, %c0_27] : memref<8x128xf32, #tpu.memory_space<vmem>>, vector<8x128xf32>
    tpu.vector_store %arg6[%c0_26, %c0_27], %71 {strides = array<i32>} : memref<8x128xf32, #tpu.memory_space<vmem>>, vector<8x128xf32>,
    return
  }
  func.func @transform_0(%arg0: i32) -> (i32, i32, i32) {
    %c0_i32 = arith.constant 0 : i32
    %c0_i32_0 = arith.constant 0 : i32
    %c0_i32_1 = arith.constant 0 : i32
    return %arg0, %c0_i32, %c0_i32_0 : i32, i32, i32
  }
  func.func @transform_1(%arg0: i32) -> (i32, i32) {
    %c0_i32 = arith.constant 0 : i32
    %c0_i32_0 = arith.constant 0 : i32
    %c0_i32_1 = arith.constant 0 : i32
    return %c0_i32, %c0_i32_0 : i32, i32
  }
  func.func @transform_2(%arg0: i32) -> (i32, i32) {
    %c0_i32 = arith.constant 0 : i32
    %c0_i32_0 = arith.constant 0 : i32
    %c0_i32_1 = arith.constant 0 : i32
    return %c0_i32, %c0_i32_0 : i32, i32
  }
  func.func @transform_3(%arg0: i32) -> (i32, i32) {
    %c0_i32 = arith.constant 0 : i32
    %c0_i32_0 = arith.constant 0 : i32
    %c0_i32_1 = arith.constant 0 : i32
    return %c0_i32, %c0_i32_0 : i32, i32
  }
  func.func @transform_4(%arg0: i32) -> (i32, i32) {
    %c0_i32 = arith.constant 0 : i32
    %c0_i32_0 = arith.constant 0 : i32
    %c0_i32_1 = arith.constant 0 : i32
    return %c0_i32, %c0_i32_0 : i32, i32
  }
  func.func @transform_5(%arg0: i32) -> (i32, i32) {
    %c0_i32 = arith.constant 0 : i32
    %c0_i32_0 = arith.constant 0 : i32
    return %arg0, %c0_i32 : i32, i32
  }
}

</mosaic_0001>

<bundles_post_ra>
// kernel: tpu_custom_call.1
= control target key start
LH: loop header
LB: loop body
LE: loop exit
PB: predicated region body
PF: predicated region fallthrough
CT: control target
= control target key end

     0   :  { %10 = vsyncpa [#allocation3], 0  ;;  %s2860_s0 = inlined_call_operand.hbm [shape: f32[8,24,32], index: 0, kind: input, shape index: {}]   ;;  %s2861_s1 = inlined_call_operand.hbm [shape: f32[128,384], index: 1, kind: input, shape index: {}]   ;;  %s2862_s2 = inlined_call_operand.hbm [shape: f32[3,128], index: 2, kind: input, shape index: {}]   ;;  %s2863_s3 = inlined_call_operand.hbm [shape: f32[384,128], index: 3, kind: input, shape index: {}]   ;;  %s2864_s4 = inlined_call_operand.hbm [shape: f32[1,128], index: 4, kind: input, shape index: {}]   ;;  %s2865_s5 = inlined_call_operand.hbm [shape: f32[8,128], index: 5, kind: output, shape index: {}]  }
   0x1   :  { %11 = vsyncpa [#allocation6], 0 }
   0x2   :  { %12 = vsyncpa [#allocation9], 0 }
   0x3   :  { %13 = vsyncpa [#allocation4], 0  ;;  %s2192_s18 = smov [#allocation5]   ;;  %s2052_s22 = scalar_lea.hbm %s2861_s1, 6144 }
   0x4   :  { %s31_s19 = sshll.u32 %s2192_s18, 4  ;;  %p2053_p0 = scmp.ne.s32.totalorder %s2861_s1, %s2052_s22  ;;  %s32_s19 = int_to_ptr.vmem [resolvable:$true] %s31_s19 }
   0x5   :  { %p2056_p1 = scmp.lt.u32.totalorder %s2052_s22, %s2861_s1 }
   0x7   :  { %p2058_p2 = pnand %p2056_p1, %p2053_p0 }
   0x9   :  { %2061 = shalt.err (!%p2058_p2)
}
   0xa   :  { %s2062_s27 = scalar_lea.vmem %s32_s19, 6144  ;;  %p2067_p4 = scmp.lt.s32.totalorder %s32_s19, %s32_s19 }
   0xb   :  { %p2063_p3 = scmp.ne.s32.totalorder %s32_s19, %s2062_s27  ;;  %p2068_p5 = scmp.lt.s32.totalorder %s2062_s27, %s2062_s27 }
   0xd   :  { %p2069_p6 = por %p2068_p5, %p2067_p4 }
   0xf   :  { %p2070_p7 = pnand %p2069_p6, %p2063_p3 }
  0x11   :  { %2073 = shalt.err (!%p2070_p7)
}
  0x12   :  { %s2193_s28 = smov 384   ;;  %s2194_s29 = smov 24  }
  0x13   :  { %37 = dma.hbm_to_vmem [thread:$0]  %s2861_s1, 6144, %s32_s19, [#allocation6], %s2193_s28, %s2193_s28, %s2194_s29  }
  0x14   :  { %s2195_s7 = smov [#allocation8]   ;;  %s2196_s9 = smov [#allocation2]  }
  0x15   :  { %s53_s8 = sshll.u32 %s2195_s7, 4  ;;  %s19_s10 = sshll.u32 %s2196_s9, 4  ;;  %s54_s8 = int_to_ptr.vmem [resolvable:$true] %s53_s8  ;;  %s20_s10 = int_to_ptr.vmem [resolvable:$true] %s19_s10 }
  0x16   :  { %s2074_s13 = scalar_lea.hbm %s2863_s3, 6144 }
  0x17   :  { %p2075_p8 = scmp.ne.s32.totalorder %s2863_s3, %s2074_s13  ;;  %p2078_p9 = scmp.lt.u32.totalorder %s2074_s13, %s2863_s3 }
  0x19   :  { %p2080_p10 = pnand %p2078_p9, %p2075_p8 }
  0x1b   :  { %2083 = shalt.err (!%p2080_p10)
}
  0x1c   :  { %s2084_s1 = scalar_lea.vmem %s54_s8, 6144  ;;  %p2089_p12 = scmp.lt.s32.totalorder %s54_s8, %s54_s8 }
  0x1d   :  { %p2085_p11 = scmp.ne.s32.totalorder %s54_s8, %s2084_s1  ;;  %p2090_p13 = scmp.lt.s32.totalorder %s2084_s1, %s2084_s1 }
  0x1f   :  { %p2091_p0 = por %p2090_p13, %p2089_p12 }
  0x21   :  { %p2092_p1 = pnand %p2091_p0, %p2085_p11 }
  0x23   :  { %2095 = shalt.err (!%p2092_p1)
}
  0x24   :  { %s2197_s18 = smov 128   ;;  %s2198_s19 = smov 8  }
  0x25   :  { %59 = dma.hbm_to_vmem [thread:$0]  %s2863_s3, 6144, %s54_s8, [#allocation9], %s2197_s18, %s2197_s18, %s2198_s19  }
  0x26   :  { %s2096_s24 = scalar_lea.hbm %s2860_s0, 3072 }
  0x27   :  { %p2097_p2 = scmp.ne.s32.totalorder %s2860_s0, %s2096_s24  ;;  %p2100_p3 = scmp.lt.u32.totalorder %s2096_s24, %s2860_s0 }
  0x29   :  { %p2102_p4 = pnand %p2100_p3, %p2097_p2 }
  0x2b   :  { %2105 = shalt.err (!%p2102_p4)
}
  0x2c   :  { %s2106_s29 = scalar_lea.vmem %s20_s10, 3072  ;;  %p2111_p6 = scmp.lt.s32.totalorder %s20_s10, %s20_s10 }
  0x2d   :  { %p2107_p5 = scmp.ne.s32.totalorder %s20_s10, %s2106_s29  ;;  %p2112_p7 = scmp.lt.s32.totalorder %s2106_s29, %s2106_s29 }
  0x2f   :  { %p2113_p8 = por %p2112_p7, %p2111_p6 }
  0x31   :  { %p2114_p9 = pnand %p2113_p8, %p2107_p5 }
  0x33   :  { %2117 = shalt.err (!%p2114_p9)
}
  0x34   :  { %25 = dma.hbm_to_vmem [thread:$0]  %s2860_s0, 3072, %s20_s10, [#allocation3], %s2197_s18, %s2197_s18, %s2198_s19  }
  0x35   :  { %s2199_s6 = smov [#allocation7]   ;;  %s2200_s8 = smov [#allocation10]  }
  0x36   :  { %s44_s7 = sshll.u32 %s2199_s6, 4  ;;  %s66_s9 = sshll.u32 %s2200_s8, 4  ;;  %s45_s7 = int_to_ptr.vmem [resolvable:$true] %s44_s7  ;;  %s67_s9 = int_to_ptr.vmem [resolvable:$true] %s66_s9 }
  0x37   :  { %s2118_s13 = scalar_lea.hbm %s2862_s2, 64 }
  0x38   :  { %p2119_p10 = scmp.ne.s32.totalorder %s2862_s2, %s2118_s13  ;;  %p2122_p11 = scmp.lt.u32.totalorder %s2118_s13, %s2862_s2 }
  0x3a   :  { %p2124_p12 = pnand %p2122_p11, %p2119_p10 }
  0x3c   :  { %2127 = shalt.err (!%p2124_p12)
}
  0x3d   :  { %s2128_s0 = scalar_lea.vmem %s45_s7, 64  ;;  %p2133_p0 = scmp.lt.s32.totalorder %s45_s7, %s45_s7 }
  0x3e   :  { %p2129_p13 = scmp.ne.s32.totalorder %s45_s7, %s2128_s0  ;;  %p2134_p1 = scmp.lt.s32.totalorder %s2128_s0, %s2128_s0 }
  0x40   :  { %p2135_p2 = por %p2134_p1, %p2133_p0 }
  0x42   :  { %p2136_p3 = pnand %p2135_p2, %p2129_p13 }
  0x44   :  { %2139 = shalt.err (!%p2136_p3)
}
  0x45   :  { %47 = dma.hbm_to_vmem [thread:$0]  %s2862_s2, 64, %s45_s7, [#allocation6]  }
  0x46   :  { %s2140_s20 = scalar_lea.hbm %s2864_s4, 16 }
  0x47   :  { %p2141_p4 = scmp.ne.s32.totalorder %s2864_s4, %s2140_s20  ;;  %p2144_p5 = scmp.lt.u32.totalorder %s2140_s20, %s2864_s4 }
  0x49   :  { %p2146_p6 = pnand %p2144_p5, %p2141_p4 }
  0x4b   :  { %2149 = shalt.err (!%p2146_p6)
}
  0x4c   :  { %s2150_s25 = scalar_lea.vmem %s67_s9, 16  ;;  %s2154_s26 = scalar_lea.vmem %s67_s9, 32 }
  0x4d   :  { %p2151_p7 = scmp.ne.s32.totalorder %s67_s9, %s2150_s25  ;;  %p2155_p8 = scmp.lt.s32.totalorder %s67_s9, %s67_s9 }
  0x4e   :  { %p2156_p9 = scmp.lt.s32.totalorder %s2154_s26, %s2150_s25 }
  0x50   :  { %p2157_p10 = por %p2156_p9, %p2155_p8 }
  0x52   :  { %p2158_p11 = pnand %p2157_p10, %p2151_p7 }
  0x54   :  { %2161 = shalt.err (!%p2158_p11)
}
  0x55   :  { %69 = dma.hbm_to_vmem [thread:$0]  %s2864_s4, 16, %s67_s9, [#allocation9]  }
  0x56   :  { %2184 = dma.done.wait [#allocation3], 3072  }
  0x57   :  { %2185 = vsyncadd [#allocation3], 4294964224 }
  0x58   :  { %2186 = dma.done.wait [#allocation6], 6208  }
  0x59   :  { %2187 = vsyncadd [#allocation6], 4294961088 }
  0x5a   :  { %2188 = dma.done.wait [#allocation9], 6160  }
  0x5b   :  { %2189 = vsyncadd [#allocation9], 4294961136  ;;  %v2201_v0 = vmov 0.0   ;;  %v2299_v1 = vld [vmem:[#allocation2] sm:$0xff]  ;;  %v2301_v2 = vld [vmem:[#allocation2 + $0x8] sm:$0xff]  ;;  %vm133_vm0 = vcmask 1046528  }
  0x5c   :  { %563 = vmatprep.mubr.f32.mxu0 %v2201_v0  ;;  %v87_v3 = vld [vmem:[#allocation2 + $0x10] sm:$0xff]  ;;  %vm311_vm1 = vcmask 1044480   ;;  %vm222_vm2 = vcmask 1045504   ;;  %v134_v4 = vrot.slane %v2299_v1, 1  ;;  %v135_v5 = vrot.slane %v2301_v2, 1  ;;  %v2306_v8 = vld [vmem:[#allocation2 + $0x18] sm:$0xff] }
  0x5d   :  { %v137_v6 = vrot.slane %v87_v3, 1  ;;  %v312_v7 = vrot.slane %v2299_v1, 3  ;;  %v313_v9 = vrot.slane %v2301_v2, 3  ;;  %v315_v10 = vrot.slane %v87_v3, 3  ;;  %v2311_v13 = vld [vmem:[#allocation2 + $0x20] sm:$0xff]  ;;  %v90_v14 = vld [vmem:[#allocation2 + $0x28] sm:$0xff] }
  0x5e   :  { %v223_v11 = vrot.slane %v2299_v1, 2  ;;  %v224_v12 = vrot.slane %v2301_v2, 2  ;;  %v136_v15 = vsel %vm133_vm0, %v134_v4, %v135_v5  ;;  %v226_v17 = vrot.slane %v87_v3, 2  ;;  %s2202_s4 = smov 32   ;;  %v2324_v31 = vld [vmem:[#allocation2 + $0x30] sm:$0xff]  ;;  %v2326_v32 = vld [vmem:[#allocation2 + $0x38] sm:$0xff] }
  0x5f   :  { %v138_v16 = vsel %vm133_vm0, %v135_v5, %v137_v6  ;;  %v139_v18 = vrot.slane %v2306_v8, 1  ;;  %v314_v20 = vsel %vm311_vm1, %v312_v7, %v313_v9  ;;  %v316_v21 = vsel %vm311_vm1, %v313_v9, %v315_v10  ;;  %s2203_s28 = smov 96   ;;  %v93_v37 = vld [vmem:[#allocation2 + $0x40] sm:$0xff]  ;;  %s2204_s29 = smov 64   ;;  %v2342_v50 = vld [vmem:[#allocation2 + $0x48] sm:$0xff]  ;;  %v2344_v51 = vld [vmem:[#allocation2 + $0x50] sm:$0xff] }
  0x60   :  { %v1947_v19 = vpack.i.bf16 %v138_v16, %v136_v15  ;;  %v225_v22 = vsel %vm222_vm2, %v223_v11, %v224_v12  ;;  %v1957_v23 = vpack.i.bf16 %v316_v21, %v314_v20  ;;  %v227_v24 = vsel %vm222_vm2, %v224_v12, %v226_v17  ;;  %v96_v56 = vld [vmem:[#allocation2 + $0x58] sm:$0xff]  ;;  %v2362_v12 = vld [vmem:[#allocation2 + $0x60] sm:$0xff]  ;;  %s2207_s3 = smov [#allocation11]  }
  0x61   :  { %v140_v25 = vrot.slane %v2311_v13, 1  ;;  %v142_v26 = vrot.slane %v90_v14, 1  ;;  %v1952_v27 = vpack.i.bf16 %v227_v24, %v225_v22  ;;  %v228_v28 = vrot.slane %v2306_v8, 2  ;;  %s1624_s30 = sshll.u32 %s2207_s3, 4  ;;  %s1625_s30 = int_to_ptr.vmem [resolvable:$true] %s1624_s30 }
  0x62   :  { %1948 = vrot.lane.b32.xlu0 %v1947_v19, %s2202_s4  ;;  %v229_v29 = vrot.slane %v2311_v13, 2  ;;  %v231_v30 = vrot.slane %v90_v14, 2  ;;  %1958 = vrot.lane.b32.xlu1 %v1957_v23, %s2203_s28  ;;  %v317_v35 = vrot.slane %v2306_v8, 3  ;;  %v318_v36 = vrot.slane %v2311_v13, 3  ;;  %v99_v19 = vld [vmem:[#allocation2 + $0x70] sm:$0xff]  ;;  %s2162_s6 = scalar_lea.vmem %s1625_s30, 128  ;;  %p2167_p13 = scmp.lt.s32.totalorder %s1625_s30, %s1625_s30 }
  0x63   :  { %v141_v33 = vsel %vm133_vm0, %v139_v18, %v140_v25  ;;  %v143_v34 = vsel %vm133_vm0, %v140_v25, %v142_v26  ;;  %v320_v41 = vrot.slane %v90_v14, 3  ;;  %v144_v44 = vrot.slane %v2324_v31, 1  ;;  %v2364_v14 = vld [vmem:[#allocation2 + $0x68] sm:$0xff]  ;;  %p2163_p12 = scmp.ne.s32.totalorder %s1625_s30, %s2162_s6  ;;  %p2168_p0 = scmp.lt.s32.totalorder %s2162_s6, %s2162_s6 }
  0x64   :  { %v1962_v38 = vpack.i.bf16 %v143_v34, %v141_v33  ;;  %v230_v39 = vsel %vm222_vm2, %v228_v28, %v229_v29  ;;  %v232_v40 = vsel %vm222_vm2, %v229_v29, %v231_v30  ;;  %v319_v43 = vsel %vm311_vm1, %v317_v35, %v318_v36 }
  0x65   :  { %v1967_v42 = vpack.i.bf16 %v232_v40, %v230_v39  ;;  %v145_v45 = vrot.slane %v2326_v32, 1  ;;  %v321_v46 = vsel %vm311_vm1, %v318_v36, %v320_v41  ;;  %v147_v47 = vrot.slane %v93_v37, 1  ;;  %v2379_v36 = vld [vmem:[#allocation2 + $0x78] sm:$0xff]  ;;  %p2169_p1 = por %p2168_p0, %p2167_p13 }
  0x66   :  { %1953 = vrot.lane.b32.xlu0 %v1952_v27, %s2204_s29  ;;  %v233_v48 = vrot.slane %v2324_v31, 2  ;;  %v234_v49 = vrot.slane %v2326_v32, 2  ;;  %1963 = vrot.lane.b32.xlu1 %v1962_v38, %s2202_s4  ;;  %v1972_v52 = vpack.i.bf16 %v321_v46, %v319_v43  ;;  %v236_v54 = vrot.slane %v93_v37, 2  ;;  %v102_v38 = vld [vmem:[#allocation2 + $0x88] sm:$0xff] }
  0x67   :  { %v146_v53 = vsel %vm133_vm0, %v144_v44, %v145_v45  ;;  %v322_v55 = vrot.slane %v2324_v31, 3  ;;  %v148_v57 = vsel %vm133_vm0, %v145_v45, %v147_v47  ;;  %v323_v59 = vrot.slane %v2326_v32, 3  ;;  %p2170_p2 = pnand %p2169_p1, %p2163_p12 }
  0x68   :  { %v235_v58 = vsel %vm222_vm2, %v233_v48, %v234_v49  ;;  %v325_v60 = vrot.slane %v93_v37, 3  ;;  %v237_v61 = vsel %vm222_vm2, %v234_v49, %v236_v54  ;;  %v149_v62 = vrot.slane %v2342_v50, 1  ;;  %v2381_v37 = vld [vmem:[#allocation2 + $0x80] sm:$0xff] }
  0x69   :  { %v150_v63 = vrot.slane %v2344_v51, 1  ;;  %v1977_v3 = vpack.i.bf16 %v148_v57, %v146_v53  ;;  %v324_v4 = vsel %vm311_vm1, %v322_v55, %v323_v59  ;;  %v152_v6 = vrot.slane %v96_v56, 1 }
  0x6a   :  { %1968 = vrot.lane.b32.xlu0 %v1967_v42, %s2204_s29  ;;  %v326_v5 = vsel %vm311_vm1, %v323_v59, %v325_v60  ;;  %1973 = vrot.lane.b32.xlu1 %v1972_v52, %s2203_s28  ;;  %v1982_v7 = vpack.i.bf16 %v237_v61, %v235_v58  ;;  %v238_v10 = vrot.slane %v2342_v50, 2  ;;  %v239_v11 = vrot.slane %v2344_v51, 2 }
  0x6b   :  { %v151_v9 = vsel %vm133_vm0, %v149_v62, %v150_v63  ;;  %v153_v15 = vsel %vm133_vm0, %v150_v63, %v152_v6  ;;  %v241_v16 = vrot.slane %v96_v56, 2  ;;  %v327_v17 = vrot.slane %v2342_v50, 3  ;;  %v2401_v62 = vld [vmem:[#allocation2 + $0x90] sm:$0xff]  ;;  %v2403_v63 = vld [vmem:[#allocation2 + $0x98] sm:$0xff] }
  0x6c   :  { %v328_v18 = vrot.slane %v2344_v51, 3  ;;  %v1987_v20 = vpack.i.bf16 %v326_v5, %v324_v4  ;;  %v1992_v21 = vpack.i.bf16 %v153_v15, %v151_v9  ;;  %v240_v22 = vsel %vm222_vm2, %v238_v10, %v239_v11 }
  0x6d   :  { %v330_v23 = vrot.slane %v96_v56, 3  ;;  %v242_v24 = vsel %vm222_vm2, %v239_v11, %v241_v16  ;;  %v154_v26 = vrot.slane %v2362_v12, 1  ;;  %v155_v27 = vrot.slane %v2364_v14, 1 }
  0x6e   :  { %1978 = vrot.lane.b32.xlu0 %v1977_v3, %s2202_s4  ;;  %v329_v25 = vsel %vm311_vm1, %v327_v17, %v328_v18  ;;  %1983 = vrot.lane.b32.xlu1 %v1982_v7, %s2204_s29  ;;  %v157_v29 = vrot.slane %v99_v19, 1  ;;  %v243_v30 = vrot.slane %v2362_v12, 2  ;;  %v244_v33 = vrot.slane %v2364_v14, 2  ;;  %v2405_v3 = vld [vmem:[#allocation2 + $0xa0] sm:$0xff] }
  0x6f   :  { %v331_v28 = vsel %vm311_vm1, %v328_v18, %v330_v23  ;;  %v246_v34 = vrot.slane %v99_v19, 2  ;;  %v1997_v35 = vpack.i.bf16 %v242_v24, %v240_v22  ;;  %v332_v40 = vrot.slane %v2362_v12, 3 }
  0x70   :  { %v2002_v39 = vpack.i.bf16 %v331_v28, %v329_v25  ;;  %v333_v41 = vrot.slane %v2364_v14, 3  ;;  %v335_v42 = vrot.slane %v99_v19, 3  ;;  %v156_v43 = vsel %vm133_vm0, %v154_v26, %v155_v27  ;;  %v452_v19 = vld [vmem:[#allocation5 + $0x8] sm:$0xff]  ;;  %v454_v25 = vld [vmem:[#allocation5 + $0x18] sm:$0xff]  ;;  %v453_v26 = vld [vmem:[#allocation5 + $0x10] sm:$0xff] }
  0x71   :  { %v158_v44 = vsel %vm133_vm0, %v155_v27, %v157_v29  ;;  %v245_v45 = vsel %vm222_vm2, %v243_v30, %v244_v33  ;;  %v247_v46 = vsel %vm222_vm2, %v244_v33, %v246_v34  ;;  %v159_v47 = vrot.slane %v2379_v36, 1  ;;  %v456_v27 = vld [vmem:[#allocation5 + $0x28] sm:$0xff]  ;;  %v458_v30 = vld [vmem:[#allocation5 + $0x38] sm:$0xff] }
  0x72   :  { %1988 = vrot.lane.b32.xlu0 %v1987_v20, %s2203_s28  ;;  %1993 = vrot.lane.b32.xlu1 %v1992_v21, %s2202_s4  ;;  %v160_v48 = vrot.slane %v2381_v37, 1  ;;  %v162_v49 = vrot.slane %v102_v38, 1  ;;  %v248_v52 = vrot.slane %v2379_v36, 2  ;;  %v249_v53 = vrot.slane %v2381_v37, 2  ;;  %v455_v20 = vld [vmem:[#allocation5 + $0x20] sm:$0xff] }
  0x73   :  { %v251_v54 = vrot.slane %v102_v38, 2  ;;  %v337_v55 = vrot.slane %v2379_v36, 3  ;;  %v338_v56 = vrot.slane %v2381_v37, 3  ;;  %v2007_v57 = vpack.i.bf16 %v158_v44, %v156_v43  ;;  %v451_v21 = vld [vmem:[#allocation5] sm:$0xff]  ;;  %v2428_v43 = vld [vmem:[#allocation2 + $0xa8] sm:$0xff] }
  0x74   :  { %v334_v58 = vsel %vm311_vm1, %v332_v40, %v333_v41  ;;  %v336_v59 = vsel %vm311_vm1, %v333_v41, %v335_v42  ;;  %v340_v60 = vrot.slane %v102_v38, 3  ;;  %v2012_v61 = vpack.i.bf16 %v247_v46, %v245_v45  ;;  %v459_v40 = vld [vmem:[#allocation5 + $0x40] sm:$0xff]  ;;  %v462_v41 = vld [vmem:[#allocation5 + $0x58] sm:$0xff] }
  0x75   :  { %v161_v4 = vsel %vm133_vm0, %v159_v47, %v160_v48  ;;  %v163_v5 = vsel %vm133_vm0, %v160_v48, %v162_v49  ;;  %v2017_v6 = vpack.i.bf16 %v336_v59, %v334_v58  ;;  %v250_v7 = vsel %vm222_vm2, %v248_v52, %v249_v53  ;;  %v457_v47 = vld [vmem:[#allocation5 + $0x30] sm:$0xff]  ;;  %v460_v48 = vld [vmem:[#allocation5 + $0x48] sm:$0xff] }
  0x76   :  { %1998 = vrot.lane.b32.xlu0 %v1997_v35, %s2204_s29  ;;  %2003 = vrot.lane.b32.xlu1 %v2002_v39, %s2203_s28  ;;  %v252_v9 = vsel %vm222_vm2, %v249_v53, %v251_v54  ;;  %v339_v10 = vsel %vm311_vm1, %v337_v55, %v338_v56  ;;  %v341_v11 = vsel %vm311_vm1, %v338_v56, %v340_v60  ;;  %v164_v15 = vrot.slane %v2401_v62, 1  ;;  %v461_v39 = vld [vmem:[#allocation5 + $0x50] sm:$0xff]  ;;  %v464_v54 = vld [vmem:[#allocation5 + $0x68] sm:$0xff] }
  0x77   :  { %v165_v16 = vrot.slane %v2403_v63, 1  ;;  %v167_v17 = vrot.slane %v2405_v3, 1  ;;  %v2022_v18 = vpack.i.bf16 %v163_v5, %v161_v4  ;;  %v253_v22 = vrot.slane %v2401_v62, 2  ;;  %v2432_v53 = vld [vmem:[#allocation2 + $0xb0] sm:$0xff]  ;;  %v468_v59 = vld [vmem:[#allocation5 + $0x88] sm:$0xff] }
  0x78   :  { %v254_v23 = vrot.slane %v2403_v63, 2  ;;  %v256_v24 = vrot.slane %v2405_v3, 2  ;;  %v2027_v28 = vpack.i.bf16 %v252_v9, %v250_v7  ;;  %v2032_v29 = vpack.i.bf16 %v341_v11, %v339_v10  ;;  %v465_v58 = vld [vmem:[#allocation5 + $0x70] sm:$0xff]  ;;  %v463_v9 = vld [vmem:[#allocation5 + $0x60] sm:$0xff]  ;;  %v466_v10 = vld [vmem:[#allocation5 + $0x78] sm:$0xff] }
  0x79   :  { %v166_v33 = vsel %vm133_vm0, %v164_v15, %v165_v16  ;;  %v168_v34 = vsel %vm133_vm0, %v165_v16, %v167_v17  ;;  %v342_v35 = vrot.slane %v2401_v62, 3  ;;  %v343_v38 = vrot.slane %v2403_v63, 3  ;;  %v470_v16 = vld [vmem:[#allocation5 + $0x98] sm:$0xff]  ;;  %v473_v17 = vld [vmem:[#allocation5 + $0xb0] sm:$0xff] }
  0x7a   :  { %2008 = vrot.lane.b32.xlu0 %v2007_v57, %s2202_s4  ;;  %2013 = vrot.lane.b32.xlu1 %v2012_v61, %s2204_s29  ;;  %v345_v42 = vrot.slane %v2405_v3, 3  ;;  %v1811_v44 = vpack.c.bf16 %v455_v20, %v452_v19  ;;  %v1813_v45 = vpack.c.bf16 %v454_v25, %v451_v21  ;;  %v1843_v46 = vpack.c.bf16 %v456_v27, %v453_v26  ;;  %v467_v57 = vld [vmem:[#allocation5 + $0x80] sm:$0xff]  ;;  %v474_v19 = vld [vmem:[#allocation5 + $0xb8] sm:$0xff]  ;;  %v469_v25 = vld [vmem:[#allocation5 + $0x90] sm:$0xff] }
  0x7b   :  { %v255_v49 = vsel %vm222_vm2, %v253_v22, %v254_v23  ;;  %v257_v52 = vsel %vm222_vm2, %v254_v23, %v256_v24  ;;  %v1815_v55 = vpack.c.bf16 %v461_v39, %v458_v30  ;;  %v1847_v56 = vpack.c.bf16 %v462_v41, %v459_v40  ;;  %v472_v26 = vld [vmem:[#allocation5 + $0xa8] sm:$0xff] }
  0x7c   :  { %1812 = vmatprep.subr.bf16.mxu0 %v1811_v44  ;;  %1844 = vmatprep.subr.bf16.mxu1 %v1843_v46  ;;  %v2037_v60 = vpack.i.bf16 %v168_v34, %v166_v33  ;;  %v169_v61 = vrot.slane %v2428_v43, 1  ;;  %v1817_v3 = vpack.c.bf16 %v460_v48, %v457_v47  ;;  %v2042_v4 = vpack.i.bf16 %v257_v52, %v255_v49  ;;  %v476_v34 = vld [vmem:[#allocation5 + $0xc8] sm:$0xff]  ;;  %v475_v44 = vld [vmem:[#allocation5 + $0xc0] sm:$0xff]  ;;  %v482_v52 = vld [vmem:[#allocation5 + $0xf8] sm:$0xff] }
  0x7d   :  { %1814 = vmatpush1.bf16.msra.mxu0 %v1813_v45  ;;  %v344_v5 = vsel %vm311_vm1, %v342_v35, %v343_v38  ;;  %v170_v7 = vrot.slane %v2432_v53, 1  ;;  %1846 = vmatpush3.bf16.msra.mxu1 %v1843_v46  ;;  %v1819_v11 = vpack.c.bf16 %v467_v57, %v464_v54  ;;  %v1851_v15 = vpack.c.bf16 %v468_v59, %v465_v58  ;;  %v479_v35 = vld [vmem:[#allocation5 + $0xe0] sm:$0xff]  ;;  %v480_v39 = vld [vmem:[#allocation5 + $0xe8] sm:$0xff]  ;;  %v478_v45 = vld [vmem:[#allocation5 + $0xd8] sm:$0xff] }
  0x7e   :  { %2018 = vrot.lane.b32.xlu0 %v2017_v6, %s2203_s28  ;;  %2023 = vrot.lane.b32.xlu1 %v2022_v18, %s2202_s4  ;;  %v346_v6 = vsel %vm311_vm1, %v343_v38, %v345_v42  ;;  %v471_v18 = vld [vmem:[#allocation5 + $0xa0] sm:$0xff]  ;;  %v1821_v21 = vpack.c.bf16 %v466_v10, %v463_v9  ;;  %v258_v23 = vrot.slane %v2428_v43, 2  ;;  %v259_v24 = vrot.slane %v2432_v53, 2  ;;  %v477_v38 = vld [vmem:[#allocation5 + $0xd0] sm:$0xff] }
  0x7f   :  { %1816 = vmatprep.subr.bf16.mxu0 %v1815_v55  ;;  %1848 = vmatprep.subr.bf16.mxu1 %v1847_v56  ;;  %v2047_v20 = vpack.i.bf16 %v346_v6, %v344_v5  ;;  %v171_v22 = vsel %vm133_vm0, %v169_v61, %v170_v7  ;;  %v347_v27 = vrot.slane %v2428_v43, 3  ;;  %v1823_v30 = vpack.c.bf16 %v473_v17, %v470_v16  ;;  %v485_v54 = vld [vmem:[#allocation5 + $0x110] sm:$0xff]  ;;  %v483_v55 = vld [vmem:[#allocation5 + $0x100] sm:$0xff]  ;;  %v484_v61 = vld [vmem:[#allocation5 + $0x108] sm:$0xff] }
  0x80   :  { %v1855_v33 = vpack.c.bf16 %v474_v19, %v471_v18  ;;  %v1825_v40 = vpack.c.bf16 %v472_v26, %v469_v25  ;;  %v260_v41 = vsel %vm222_vm2, %v258_v23, %v259_v24  ;;  %v1827_v48 = vpack.c.bf16 %v479_v35, %v476_v34  ;;  %v488_v6 = vld [vmem:[#allocation5 + $0x128] sm:$0xff]  ;;  %v491_v9 = vld [vmem:[#allocation5 + $0x140] sm:$0xff]  ;;  %v489_v10 = vld [vmem:[#allocation5 + $0x130] sm:$0xff] }
  0x81   :  { %1818 = vmatpush1.bf16.msra.mxu0 %v1817_v3  ;;  %1850 = vmatpush3.bf16.msra.mxu1 %v1847_v56  ;;  %v1859_v49 = vpack.c.bf16 %v480_v39, %v477_v38  ;;  %v486_v56 = vld [vmem:[#allocation5 + $0x118] sm:$0xff]  ;;  %v1829_v57 = vpack.c.bf16 %v478_v45, %v475_v44  ;;  %v1835_v16 = vpack.c.bf16 %v491_v9, %v488_v6  ;;  %v487_v17 = vld [vmem:[#allocation5 + $0x120] sm:$0xff]  ;;  %v493_v26 = vld [vmem:[#allocation5 + $0x150] sm:$0xff]  ;;  %vm400_vm3 = vcmask 261120  }
  0x82   :  { %2028 = vrot.lane.b32.xlu0 %v2027_v28, %s2204_s29  ;;  %2033 = vrot.lane.b32.xlu1 %v2032_v29, %s2203_s28  ;;  %v348_v28 = vrot.slane %v2432_v53, 3  ;;  %v108_v29 = vld [vmem:[#allocation2 + $0xb8] sm:$0xff]  ;;  %v1863_v5 = vpack.c.bf16 %v486_v56, %v483_v55  ;;  %vm417_vm4 = vcmask 523264   ;;  %vm434_vm5 = vcmask 785408  }
  0x83   :  { %1820 = vmatprep.subr.bf16.mxu0 %v1819_v11  ;;  %1852 = vmatprep.subr.bf16.mxu1 %v1851_v15  ;;  %v172_v42 = vrot.slane %v108_v29, 1  ;;  %v261_v47 = vrot.slane %v108_v29, 2  ;;  %v350_v59 = vrot.slane %v108_v29, 3  ;;  %v492_v11 = vld [vmem:[#allocation5 + $0x148] sm:$0xff]  ;;  %v490_v18 = vld [vmem:[#allocation5 + $0x138] sm:$0xff]  ;;  %vm2206_vm6 = vmmov 0  }
  0x84   :  { %v349_v46 = vsel %vm311_vm1, %v347_v27, %v348_v28  ;;  %v1867_v19 = vpack.c.bf16 %v492_v11, %v489_v10  ;;  %v498_v23 = vld [vmem:[#allocation5 + $0x178] sm:$0xff]  ;;  %v496_v27 = vld [vmem:[#allocation5 + $0x168] sm:$0xff]  ;;  %vm1375_vm10 = vcmask 1041409   ;;  %vm1377_vm11 = vcmask 1042434  }
  0x85   :  { %1822 = vmatpush1.bf16.msra.mxu0 %v1821_v21  ;;  %1854 = vmatpush3.bf16.msra.mxu1 %v1851_v15  ;;  %v173_v58 = vsel %vm133_vm0, %v170_v7, %v172_v42  ;;  %v262_v3 = vsel %vm222_vm2, %v259_v24, %v261_v47  ;;  %v351_v7 = vsel %vm311_vm1, %v348_v28, %v350_v59  ;;  %v497_v21 = vld [vmem:[#allocation5 + $0x170] sm:$0xff]  ;;  %vm1379_vm12 = vcmask 1043459  }
  0x86   :  { %2038 = vrot.lane.b32.xlu0 %v2037_v60, %s2202_s4  ;;  %2043 = vrot.lane.b32.xlu1 %v2042_v4, %s2204_s29  ;;  %v481_v60 = vld [vmem:[#allocation5 + $0xf0] sm:$0xff]  ;;  %v1831_v4 = vpack.c.bf16 %v485_v54, %v482_v52  ;;  %v1837_v24 = vpack.c.bf16 %v490_v18, %v487_v17  ;;  %v1841_v29 = vpack.c.bf16 %v496_v27, %v493_v26  ;;  %vm1381_vm13 = vcmask 1044484  }
  0x87   :  { %1824 = vmatprep.subr.bf16.mxu0 %v1823_v30  ;;  %1856 = vmatprep.subr.bf16.mxu1 %v1855_v33  ;;  %v1833_v15 = vpack.c.bf16 %v484_v61, %v481_v60  ;;  %vm1383_vm14 = vcmask 1045509   ;;  %vm1385_vm15 = vcmask 1046534   ;;  %vm1387_vm0 = vcmask 1047559  }
  0x89   :  { %1826 = vmatpush1.bf16.msra.mxu0 %v1825_v40  ;;  %1858 = vmatpush3.bf16.msra.mxu1 %v1855_v33 }
  0x8a   :  { %2048 = vrot.lane.b32.xlu0 %v2047_v20, %s2203_s28  ;;  %202 = vrot.lane.b32.xlu1 %v171_v22, %s2202_s4  ;;  %v494_v20 = vld [vmem:[#allocation5 + $0x158] sm:$0xff]  ;;  %v495_v22 = vld [vmem:[#allocation5 + $0x160] sm:$0xff] }
  0x8b   :  { %1828 = vmatprep.subr.bf16.mxu0 %v1827_v48  ;;  %1860 = vmatprep.subr.bf16.mxu1 %v1859_v49  ;;  %v1839_v25 = vpack.c.bf16 %v497_v21, %v494_v20  ;;  %v1871_v28 = vpack.c.bf16 %v498_v23, %v495_v22 }
  0x8d   :  { %1830 = vmatpush1.bf16.msra.mxu0 %v1829_v57  ;;  %1862 = vmatpush3.bf16.msra.mxu1 %v1859_v49 }
  0x8e   :  { %291 = vrot.lane.b32.xlu0 %v260_v41, %s2204_s29  ;;  %380 = vrot.lane.b32.xlu1 %v349_v46, %s2203_s28 }
  0x8f   :  { %1832 = vmatprep.subr.bf16.mxu0 %v1831_v4  ;;  %1864 = vmatprep.subr.bf16.mxu1 %v1863_v5 }
  0x91   :  { %1834 = vmatpush1.bf16.msra.mxu0 %v1833_v15  ;;  %1866 = vmatpush3.bf16.msra.mxu1 %v1863_v5 }
  0x92   :  { %204 = vrot.lane.b32.xlu0 %v173_v58, %s2202_s4  ;;  %293 = vrot.lane.b32.xlu1 %v262_v3, %s2204_s29 }
  0x93   :  { %1836 = vmatprep.subr.bf16.mxu0 %v1835_v16  ;;  %1868 = vmatprep.subr.bf16.mxu1 %v1867_v19 }
  0x95   :  { %1838 = vmatpush1.bf16.msra.mxu0 %v1837_v24  ;;  %1870 = vmatpush3.bf16.msra.mxu1 %v1867_v19 }
  0x96   :  { %382 = vrot.lane.b32.xlu0 %v351_v7, %s2203_s28  ;;  %1840 = vmatprep.subr.bf16.mxu0 %v1839_v25 }
  0x97   :  { %1872 = vmatprep.subr.bf16.mxu1 %v1871_v28 }
  0x99   :  { %1842 = vmatpush1.bf16.msra.mxu0 %v1841_v29  ;;  %1874 = vmatpush3.bf16.msra.mxu1 %v1871_v28 }
  0xd4   :  { %v1949_v30 = vpop.permute.xlu0 %1948  ;;  %v1959_v33 = vpop.permute.xlu1 %1958 }
  0xd5   :  { %v1951_v34 = vunpack.i.h.bf16 %v1949_v30  ;;  %v1950_v35 = vunpack.i.l.bf16 %v1949_v30  ;;  %v1961_v38 = vunpack.i.h.bf16 %v1959_v33  ;;  %v1960_v39 = vunpack.i.l.bf16 %v1959_v33 }
  0xd7   :  { %v401_v47 = vsel %vm400_vm3, %v2299_v1, %v1950_v35  ;;  %v402_v48 = vsel %vm400_vm3, %v2301_v2, %v1951_v34 }
  0xd8   :  { %v1954_v40 = vpop.permute.xlu0 %1953  ;;  %v1964_v44 = vpop.permute.xlu1 %1963 }
  0xd9   :  { %v1956_v41 = vunpack.i.h.bf16 %v1954_v40  ;;  %v1955_v42 = vunpack.i.l.bf16 %v1954_v40  ;;  %v1966_v45 = vunpack.i.h.bf16 %v1964_v44  ;;  %v1965_v46 = vunpack.i.l.bf16 %v1964_v44 }
  0xdb   :  { %v418_v49 = vsel %vm417_vm4, %v401_v47, %v1955_v42  ;;  %v419_v52 = vsel %vm417_vm4, %v402_v48, %v1956_v41  ;;  %v403_v57 = vsel %vm400_vm3, %v2306_v8, %v1965_v46  ;;  %v404_v58 = vsel %vm400_vm3, %v2311_v13, %v1966_v45 }
  0xdc   :  { %v1969_v54 = vpop.permute.xlu0 %1968  ;;  %v435_v55 = vsel %vm434_vm5, %v418_v49, %v1960_v39  ;;  %v436_v56 = vsel %vm434_vm5, %v419_v52, %v1961_v38  ;;  %v1974_v60 = vpop.permute.xlu1 %1973 }
  0xdd   :  { %v1971_v59 = vunpack.i.h.bf16 %v1969_v54  ;;  %v1970_v1 = vunpack.i.l.bf16 %v1969_v54  ;;  %564 = vmatmul.mubr.f32.vlgmr.msra.gmra.mrb[0].mxu0 %v435_v55  ;;  %1752 = vmatprep.mubr.f32.mxu1 %v435_v55  ;;  %v1976_v2 = vunpack.i.h.bf16 %v1974_v60  ;;  %v1975_v61 = vunpack.i.l.bf16 %v1974_v60 }
  0xde   :  { %1753 = vmatmul.mubr.f32.vlgmr.msra.gmra.mrb[0].mxu1 %v436_v56  ;;  %569 = vmatprep.mubr.f32.mxu0 %v2201_v0 }
  0xdf   :  { %v420_v3 = vsel %vm417_vm4, %v403_v57, %v1970_v1  ;;  %v421_v4 = vsel %vm417_vm4, %v404_v58, %v1971_v59 }
  0xe0   :  { %v1979_v5 = vpop.permute.xlu0 %1978  ;;  %v437_v8 = vsel %vm434_vm5, %v420_v3, %v1975_v61  ;;  %v438_v6 = vsel %vm434_vm5, %v421_v4, %v1976_v2  ;;  %v1984_v10 = vpop.permute.xlu1 %1983 }
  0xe1   :  { %v1981_v13 = vunpack.i.h.bf16 %v1979_v5  ;;  %v1980_v9 = vunpack.i.l.bf16 %v1979_v5  ;;  %570 = vmatmul.mubr.f32.gmra.mrb[2].mxu0 %v436_v56  ;;  %1755 = vmatprep.mubr.f32.mxu1 %v437_v8  ;;  %v1986_v11 = vunpack.i.h.bf16 %v1984_v10  ;;  %v1985_v15 = vunpack.i.l.bf16 %v1984_v10 }
  0xe2   :  { %1756 = vmatmul.mubr.f32.gmra.mrb[2].mxu1 %v438_v6  ;;  %575 = vmatprep.mubr.f32.mxu0 %v2201_v0 }
  0xe3   :  { %v405_v7 = vsel %vm400_vm3, %v2324_v31, %v1980_v9  ;;  %v406_v16 = vsel %vm400_vm3, %v2326_v32, %v1981_v13 }
  0xe4   :  { %v1989_v17 = vpop.permute.xlu0 %1988  ;;  %v422_v18 = vsel %vm417_vm4, %v405_v7, %v1985_v15  ;;  %v423_v19 = vsel %vm417_vm4, %v406_v16, %v1986_v11  ;;  %v1994_v22 = vpop.permute.xlu1 %1993 }
  0xe5   :  { %v1991_v20 = vunpack.i.h.bf16 %v1989_v17  ;;  %v1990_v21 = vunpack.i.l.bf16 %v1989_v17  ;;  %576 = vmatmul.mubr.f32.gmra.mrb[4].mxu0 %v437_v8  ;;  %v1996_v23 = vunpack.i.h.bf16 %v1994_v22  ;;  %v1995_v24 = vunpack.i.l.bf16 %v1994_v22 }
  0xe6   :  { %581 = vmatprep.mubr.f32.mxu0 %v2201_v0 }
  0xe7   :  { %v439_v25 = vsel %vm434_vm5, %v422_v18, %v1990_v21  ;;  %v440_v31 = vsel %vm434_vm5, %v423_v19, %v1991_v20  ;;  %v407_v32 = vsel %vm400_vm3, %v2342_v50, %v1995_v24  ;;  %v408_v27 = vsel %vm400_vm3, %v2344_v51, %v1996_v23 }
  0xe8   :  { %v1999_v26 = vpop.permute.xlu0 %1998  ;;  %1758 = vmatprep.mubr.f32.mxu1 %v439_v25  ;;  %v2004_v30 = vpop.permute.xlu1 %2003 }
  0xe9   :  { %v2001_v28 = vunpack.i.h.bf16 %v1999_v26  ;;  %v2000_v29 = vunpack.i.l.bf16 %v1999_v26  ;;  %582 = vmatmul.mubr.f32.gmra.mrb[6].mxu0 %v438_v6  ;;  %1759 = vmatmul.mubr.f32.gmra.mrb[4].mxu1 %v440_v31  ;;  %v2006_v33 = vunpack.i.h.bf16 %v2004_v30  ;;  %v2005_v34 = vunpack.i.l.bf16 %v2004_v30 }
  0xea   :  { %587 = vmatprep.mubr.f32.mxu0 %v2201_v0 }
  0xeb   :  { %v424_v35 = vsel %vm417_vm4, %v407_v32, %v2000_v29  ;;  %v425_v38 = vsel %vm417_vm4, %v408_v27, %v2001_v28 }
  0xec   :  { %v2009_v39 = vpop.permute.xlu0 %2008  ;;  %v441_v40 = vsel %vm434_vm5, %v424_v35, %v2005_v34  ;;  %v442_v50 = vsel %vm434_vm5, %v425_v38, %v2006_v33  ;;  %v2014_v42 = vpop.permute.xlu1 %2013  ;;  %v1454_v34 = vld [vmem:[#allocation8 + $0x100] sm:$0xff]  ;;  %v1455_v35 = vld [vmem:[#allocation8 + $0x108] sm:$0xff] }
  0xed   :  { %v2011_v41 = vunpack.i.h.bf16 %v2009_v39  ;;  %v2010_v51 = vunpack.i.l.bf16 %v2009_v39  ;;  %588 = vmatmul.mubr.f32.gmra.mrb[8].mxu0 %v439_v25  ;;  %1761 = vmatprep.mubr.f32.mxu1 %v441_v40  ;;  %v2016_v44 = vunpack.i.h.bf16 %v2014_v42  ;;  %v2015_v45 = vunpack.i.l.bf16 %v2014_v42  ;;  %v1456_v39 = vld [vmem:[#allocation8 + $0x110] sm:$0xff] }
  0xee   :  { %1762 = vmatmul.mubr.f32.gmra.mrb[6].mxu1 %v442_v50  ;;  %593 = vmatprep.mubr.f32.mxu0 %v2201_v0  ;;  %v1908_v38 = vpack.c.bf16 %v1455_v35, %v1454_v34 }
  0xef   :  { %v409_v46 = vsel %vm400_vm3, %v2362_v12, %v2010_v51  ;;  %v410_v47 = vsel %vm400_vm3, %v2364_v14, %v2011_v41  ;;  %v1458_v41 = vld [vmem:[#allocation8 + $0x120] sm:$0xff]  ;;  %v1459_v51 = vld [vmem:[#allocation8 + $0x128] sm:$0xff] }
  0xf0   :  { %v2019_v48 = vpop.permute.xlu0 %2018  ;;  %v426_v49 = vsel %vm417_vm4, %v409_v46, %v2015_v45  ;;  %v427_v52 = vsel %vm417_vm4, %v410_v47, %v2016_v44  ;;  %v2024_v56 = vpop.permute.xlu1 %2023  ;;  %v1914_v42 = vpack.c.bf16 %v1459_v51, %v1458_v41  ;;  %v1460_v44 = vld [vmem:[#allocation8 + $0x130] sm:$0xff]  ;;  %v1461_v45 = vld [vmem:[#allocation8 + $0x138] sm:$0xff]  ;;  %v1438_v47 = vld [vmem:[#allocation8 + $0x80] sm:$0xff] }
  0xf1   :  { %v2021_v54 = vunpack.i.h.bf16 %v2019_v48  ;;  %v2020_v55 = vunpack.i.l.bf16 %v2019_v48  ;;  %594 = vmatmul.mubr.f32.gmra.mrb[10].mxu0 %v440_v31  ;;  %v2026_v57 = vunpack.i.h.bf16 %v2024_v56  ;;  %v2025_v58 = vunpack.i.l.bf16 %v2024_v56  ;;  %v1439_v48 = vld [vmem:[#allocation8 + $0x88] sm:$0xff] }
  0xf2   :  { %599 = vmatprep.mubr.f32.mxu0 %v2201_v0  ;;  %v1917_v46 = vpack.c.bf16 %v1461_v45, %v1460_v44  ;;  %v1463_v56 = vld [vmem:[#allocation8 + $0x148] sm:$0xff] }
  0xf3   :  { %v443_v59 = vsel %vm434_vm5, %v426_v49, %v2020_v55  ;;  %v444_v12 = vsel %vm434_vm5, %v427_v52, %v2021_v54  ;;  %v411_v14 = vsel %vm400_vm3, %v2379_v36, %v2025_v58  ;;  %v412_v60 = vsel %vm400_vm3, %v2381_v37, %v2026_v57  ;;  %v1462_v49 = vld [vmem:[#allocation8 + $0x140] sm:$0xff]  ;;  %v1423_v55 = vld [vmem:[#allocation8 + $0x8] sm:$0xff] }
  0xf4   :  { %v2029_v1 = vpop.permute.xlu0 %2028  ;;  %1764 = vmatprep.mubr.f32.mxu1 %v443_v59  ;;  %v2034_v3 = vpop.permute.xlu1 %2033  ;;  %v1875_v52 = vpack.c.bf16 %v1439_v48, %v1438_v47  ;;  %v1422_v54 = vld [vmem:[#allocation8] sm:$0xff]  ;;  %v1920_v58 = vpack.c.bf16 %v1463_v56, %v1462_v49  ;;  %v1431_v56 = vld [vmem:[#allocation8 + $0x48] sm:$0xff] }
  0xf5   :  { %v2031_v2 = vunpack.i.h.bf16 %v2029_v1  ;;  %v2030_v61 = vunpack.i.l.bf16 %v2029_v1  ;;  %600 = vmatmul.mubr.f32.gmra.mrb[12].mxu0 %v441_v40  ;;  %1765 = vmatmul.mubr.f32.gmra.mrb[8].mxu1 %v444_v12  ;;  %v2036_v4 = vunpack.i.h.bf16 %v2034_v3  ;;  %v2035_v5 = vunpack.i.l.bf16 %v2034_v3  ;;  %v1457_v40 = vld [vmem:[#allocation8 + $0x118] sm:$0xff]  ;;  %v1464_v1 = vld [vmem:[#allocation8 + $0x150] sm:$0xff] }
  0xf6   :  { %605 = vmatprep.mubr.f32.mxu0 %v2201_v0  ;;  %v1877_v57 = vpack.c.bf16 %v1423_v55, %v1422_v54  ;;  %1876 = vmatprep.subr.bf16.mxu1 %v1875_v52  ;;  %v806_v3 = vlaneseq  ;;  %v1430_v55 = vld [vmem:[#allocation8 + $0x40] sm:$0xff] }
  0xf7   :  { %v428_v8 = vsel %vm417_vm4, %v411_v14, %v2030_v61  ;;  %v429_v6 = vsel %vm417_vm4, %v412_v60, %v2031_v2  ;;  %v1424_v60 = vld [vmem:[#allocation8 + $0x10] sm:$0xff]  ;;  %v1425_v2 = vld [vmem:[#allocation8 + $0x18] sm:$0xff] }
  0xf8   :  { %v2039_v13 = vpop.permute.xlu0 %2038  ;;  %v445_v9 = vsel %vm434_vm5, %v428_v8, %v2035_v5  ;;  %v446_v36 = vsel %vm434_vm5, %v429_v6, %v2036_v4  ;;  %v2044_v11 = vpop.permute.xlu1 %2043  ;;  %1878 = vmatpush3.bf16.msra.mxu1 %v1877_v57  ;;  %v1465_v61 = vld [vmem:[#allocation8 + $0x158] sm:$0xff]  ;;  %v1881_v4 = vpack.c.bf16 %v1425_v2, %v1424_v60  ;;  %v1442_v8 = vld [vmem:[#allocation8 + $0xa0] sm:$0xff]  ;;  %v1443_v6 = vld [vmem:[#allocation8 + $0xa8] sm:$0xff] }
  0xf9   :  { %v2041_v10 = vunpack.i.h.bf16 %v2039_v13  ;;  %v2040_v37 = vunpack.i.l.bf16 %v2039_v13  ;;  %606 = vmatmul.mubr.f32.gmra.mrb[14].mxu0 %v442_v50  ;;  %1767 = vmatprep.mubr.f32.mxu1 %v445_v9  ;;  %v2046_v15 = vunpack.i.h.bf16 %v2044_v11  ;;  %v2045_v7 = vunpack.i.l.bf16 %v2044_v11  ;;  %v1466_v13 = vld [vmem:[#allocation8 + $0x160] sm:$0xff]  ;;  %v1448_v57 = vld [vmem:[#allocation8 + $0xd0] sm:$0xff] }
  0xfa   :  { %1768 = vmatmul.mubr.f32.gmra.mrb[10].mxu1 %v446_v36  ;;  %611 = vmatprep.mubr.f32.mxu0 %v2201_v0  ;;  %v1911_v50 = vpack.c.bf16 %v1457_v40, %v1456_v39  ;;  %v1923_v5 = vpack.c.bf16 %v1465_v61, %v1464_v1  ;;  %v807_v11 = vshrl.u32 %v806_v3, 7  ;;  %v1893_v3 = vpack.c.bf16 %v1431_v56, %v1430_v55 }
  0xfb   :  { %v413_v16 = vsel %vm400_vm3, %v2401_v62, %v2040_v37  ;;  %v414_v17 = vsel %vm400_vm3, %v2403_v63, %v2041_v10  ;;  %v1427_v10 = vld [vmem:[#allocation8 + $0x28] sm:$0xff] }
  0xfc   :  { %v2049_v18 = vpop.permute.xlu0 %2048  ;;  %v430_v19 = vsel %vm417_vm4, %v413_v16, %v2045_v7  ;;  %v431_v20 = vsel %vm417_vm4, %v414_v17, %v2046_v15  ;;  %v203_v23 = vpop.permute.xlu1 %202  ;;  %v1467_v37 = vld [vmem:[#allocation8 + $0x168] sm:$0xff]  ;;  %v1444_v16 = vld [vmem:[#allocation8 + $0xb0] sm:$0xff]  ;;  %v1445_v17 = vld [vmem:[#allocation8 + $0xb8] sm:$0xff] }
  0xfd   :  { %v2051_v21 = vunpack.i.h.bf16 %v2049_v18  ;;  %v2050_v22 = vunpack.i.l.bf16 %v2049_v18  ;;  %612 = vmatmul.mubr.f32.gmra.mrb[16].mxu0 %v443_v59  ;;  %v415_v24 = vsel %vm400_vm3, %v2428_v43, %v203_v23  ;;  %v1440_v59 = vld [vmem:[#allocation8 + $0x90] sm:$0xff]  ;;  %v1926_v7 = vpack.c.bf16 %v1467_v37, %v1466_v13 }
  0xfe   :  { %617 = vmatprep.mubr.f32.mxu0 %v2201_v0  ;;  %v1468_v18 = vld [vmem:[#allocation8 + $0x170] sm:$0xff]  ;;  %v811_v23 = vsub.s32 0, %v807_v11 }
  0xff   :  { %v447_v25 = vsel %vm434_vm5, %v430_v19, %v2050_v22  ;;  %v448_v62 = vsel %vm434_vm5, %v431_v20, %v2051_v21  ;;  %v1887_v19 = vpack.c.bf16 %v1445_v17, %v1444_v16  ;;  %v1428_v20 = vld [vmem:[#allocation8 + $0x30] sm:$0xff]  ;;  %v1429_v21 = vld [vmem:[#allocation8 + $0x38] sm:$0xff] }
 0x100   :  { %v292_v31 = vpop.permute.xlu0 %291  ;;  %1770 = vmatprep.mubr.f32.mxu1 %v447_v25  ;;  %v381_v26 = vpop.permute.xlu1 %380  ;;  %v1469_v22 = vld [vmem:[#allocation8 + $0x178] sm:$0xff] }
 0x101   :  { %v432_v63 = vsel %vm417_vm4, %v415_v24, %v292_v31  ;;  %618 = vmatmul.mubr.f32.gmra.mrb[18].mxu0 %v444_v12  ;;  %1771 = vmatmul.mubr.f32.gmra.mrb[12].mxu1 %v448_v62  ;;  %v1441_v12 = vld [vmem:[#allocation8 + $0x98] sm:$0xff]  ;;  %v1889_v24 = vpack.c.bf16 %v1429_v21, %v1428_v20  ;;  %v997_v31 = vsub.s32 1, %v807_v11 }
 0x102   :  { %623 = vmatprep.mubr.f32.mxu0 %v2201_v0  ;;  %v449_v32 = vsel %vm434_vm5, %v432_v63, %v381_v26  ;;  %v1879_v14 = vpack.c.bf16 %v1441_v12, %v1440_v59  ;;  %v1183_v63 = vsub.s32 2, %v807_v11  ;;  %v1446_v26 = vld [vmem:[#allocation8 + $0xc0] sm:$0xff] }
 0x103   :  { %1773 = vmatprep.mubr.f32.mxu1 %v449_v32 }
 0x104   :  { %v205_v27 = vpop.permute.xlu0 %204  ;;  %v294_v28 = vpop.permute.xlu1 %293  ;;  %1880 = vmatprep.subr.bf16.mxu1 %v1879_v14  ;;  %v1449_v14 = vld [vmem:[#allocation8 + $0xd8] sm:$0xff] }
 0x105   :  { %v416_v43 = vsel %vm400_vm3, %v2432_v53, %v205_v27  ;;  %624 = vmatmul.mubr.f32.gmra.mrb[20].mxu0 %v445_v9  ;;  %v2205_v53 = vmov 0.0|0.0   ;;  %1882 = vmatpush3.bf16.msra.mxu1 %v1881_v4  ;;  %v1883_v9 = vpack.c.bf16 %v1443_v6, %v1442_v8  ;;  %v1895_v4 = vpack.c.bf16 %v1449_v14, %v1448_v57 }
 0x106   :  { %v433_v29 = vsel %vm417_vm4, %v416_v43, %v294_v28  ;;  %629 = vmatprep.mubr.f32.mxu0 %v2201_v0  ;;  %1907 = vmatprep.subr.bf16.mxu0 %v2205_v53 }
 0x107   :  { %1909 = vmatpush3.bf16.msra.mxu0 %v1908_v38  ;;  %1884 = vmatprep.subr.bf16.mxu1 %v1883_v9 }
 0x108   :  { %v383_v30 = vpop.permute.xlu0 %382  ;;  %1910 = vmatprep.subr.bf16.mxu0 %v2205_v53 }
 0x109   :  { %630 = vmatmul.mubr.f32.gmra.mrb[22].mxu0 %v446_v36  ;;  %v450_v33 = vsel %vm434_vm5, %v433_v29, %v383_v30  ;;  %v1426_v36 = vld [vmem:[#allocation8 + $0x20] sm:$0xff]  ;;  %v2553_v30 = vadd.s32 8, %v807_v11 }
 0x10a   :  { %1774 = vmatmul.mubr.f32.gmra.mrb[14].mxu1 %v450_v33  ;;  %635 = vmatprep.mubr.f32.mxu0 %v2201_v0  ;;  %v1885_v15 = vpack.c.bf16 %v1427_v10, %v1426_v36 }
 0x10b   :  { %1912 = vmatpush3.bf16.msra.mxu0 %v1911_v50  ;;  %vm1218_vm7 = vcmp.lt.s32.totalorder %v2553_v30, 13  ;;  %vm846_vm8 = vcmp.lt.s32.totalorder %v2553_v30, 15  ;;  %vm1032_vm9 = vcmp.lt.s32.totalorder %v2553_v30, 14 }
 0x10c   :  { %1913 = vmatprep.subr.bf16.mxu0 %v2205_v53  ;;  %1886 = vmatpush3.bf16.msra.mxu1 %v1885_v15 }
 0x10d   :  { %636 = vmatmul.mubr.f32.gmra.mrb[24].mxu0 %v447_v25  ;;  %v1929_v25 = vpack.c.bf16 %v1469_v22, %v1468_v18  ;;  %1888 = vmatprep.subr.bf16.mxu1 %v1887_v19 }
 0x10e   :  { %641 = vmatprep.mubr.f32.mxu0 %v2201_v0 }
 0x10f   :  { %1915 = vmatpush3.bf16.msra.mxu0 %v1914_v42 }
 0x110   :  { %1916 = vmatprep.subr.bf16.mxu0 %v2205_v53  ;;  %1890 = vmatpush3.bf16.msra.mxu1 %v1889_v24 }
 0x111   :  { %642 = vmatmul.mubr.f32.gmra.mrb[26].mxu0 %v448_v62  ;;  %v805_v62 = vld [vmem:[#allocation7] sm:$0x7] }
 0x112   :  { %647 = vmatprep.mubr.f32.mxu0 %v2201_v0  ;;  %v2547_v43 = vrot.slane %v805_v62, %v811_v23  ;;  %v2549_v28 = vrot.slane %v805_v62, %v997_v31  ;;  %v2551_v29 = vrot.slane %v805_v62, %v1183_v63 }
 0x113   :  { %1918 = vmatpush3.bf16.msra.mxu0 %v1917_v46 }
 0x114   :  { %1919 = vmatprep.subr.bf16.mxu0 %v2205_v53 }
 0x115   :  { %648 = vmatmul.mubr.f32.gmra.mrb[28].mxu0 %v449_v32  ;;  %v1447_v32 = vld [vmem:[#allocation8 + $0xc8] sm:$0xff] }
 0x116   :  { %653 = vmatprep.mubr.f32.mxu0 %v2201_v0  ;;  %v1891_v27 = vpack.c.bf16 %v1447_v32, %v1446_v26 }
 0x117   :  { %1921 = vmatpush3.bf16.msra.mxu0 %v1920_v58 }
 0x118   :  { %1922 = vmatprep.subr.bf16.mxu0 %v2205_v53  ;;  %1892 = vmatprep.subr.bf16.mxu1 %v1891_v27 }
 0x119   :  { %654 = vmatmul.mubr.f32.gmra.mrb[30].mxu0 %v450_v33  ;;  %1894 = vmatpush3.bf16.msra.mxu1 %v1893_v3 }
 0x11a   :  { %1808 = vmatprep.mubr.msk.f32.mxu0 %vm2206_vm6, %v2201_v0  ;;  %1896 = vmatprep.subr.bf16.mxu1 %v1895_v4 }
 0x11b   :  { %1924 = vmatpush3.bf16.msra.mxu0 %v1923_v5 }
 0x11c   :  { %1925 = vmatprep.subr.bf16.mxu0 %v2205_v53 }
 0x11f   :  { %1927 = vmatpush3.bf16.msra.mxu0 %v1926_v7 }
 0x120   :  { %1928 = vmatprep.subr.bf16.mxu0 %v2205_v53 }
 0x123   :  { %1930 = vmatpush3.bf16.msra.mxu0 %v1929_v25 }
 0x1b0   :  { %v565_v33 = vpop.f32.mrb[0].mxu0 }
 0x1b1   :  { %v813_v53 = vadd.f32 %v2547_v43, %v565_v33  ;;  %v567_v34 = vpop.f32.mrb[1].mxu0  ;;  %v1754_v35 = vpop.f32.mrb[0].mxu1 }
 0x1b2   :  { %v999_v38 = vadd.f32 %v2549_v28, %v567_v34  ;;  %v1186_v39 = vadd.f32 %v1754_v35, %v2551_v29  ;;  %v726_v0 = vpop.f32.mrb[1].mxu1 }
 0x1b3   :  { %v1185_v40 = vadd.f32 %v2551_v29, %v726_v0  ;;  %v829_v51 = vmax.f32 %v813_v53, 0.0 }
 0x1b4   :  { %v1202_v50 = vmax.f32 %v1186_v39, 0.0  ;;  %v571_v41 = vpop.f32.mrb[2].mxu0  ;;  %v1015_v47 = vmax.f32 %v999_v38, 0.0 }
 0x1b5   :  { %v1201_v42 = vmax.f32 %v1185_v40, 0.0  ;;  %v814_v44 = vadd.f32 %v2547_v43, %v571_v41  ;;  %v573_v45 = vpop.f32.mrb[3].mxu0  ;;  %v1757_v46 = vpop.f32.mrb[2].mxu1 }
 0x1b6   :  { %v1224_v48 = vsel %vm1218_vm7, %v1202_v50, 0.0  ;;  %v1000_v49 = vadd.f32 %v2549_v28, %v573_v45  ;;  %v1188_v52 = vadd.f32 %v1757_v46, %v2551_v29  ;;  %v736_v54 = vpop.f32.mrb[3].mxu1 }
 0x1b7   :  { %v1239_v58 = vmax.f32 %v1201_v42, %v1224_v48  ;;  %v1295_v59 = vadd.f32 %v1224_v48, %v1201_v42  ;;  %v830_v12 = vmax.f32 %v814_v44, 0.0  ;;  %v1187_v1 = vadd.f32 %v2551_v29, %v736_v54 }
 0x1b8   :  { %v1016_v60 = vmax.f32 %v1000_v49, 0.0  ;;  %v1204_v2 = vmax.f32 %v1188_v52, 0.0  ;;  %v2568_v61 = vpop.f32.mrb[4].mxu0 }
 0x1b9   :  { %v1240_v5 = vrot.slane %v1239_v58, 4  ;;  %v1296_v8 = vrot.slane %v1295_v59, 4  ;;  %v852_v6 = vsel %vm846_vm8, %v830_v12, 0.0  ;;  %v1203_v13 = vmax.f32 %v1187_v1, 0.0  ;;  %v2572_v9 = vpop.f32.mrb[5].mxu0 }
 0x1ba   :  { %v867_v36 = vmax.f32 %v829_v51, %v852_v6  ;;  %v923_v10 = vadd.f32 %v852_v6, %v829_v51  ;;  %v1038_v37 = vsel %vm1032_vm9, %v1016_v60, 0.0  ;;  %v1226_v11 = vsel %vm1218_vm7, %v1204_v2, 0.0 }
 0x1bb   :  { %v1241_v15 = vmax.f32 %v1239_v58, %v1240_v5  ;;  %v1297_v7 = vadd.f32 %v1296_v8, %v1295_v59  ;;  %v1053_v16 = vmax.f32 %v1015_v47, %v1038_v37  ;;  %v1109_v17 = vadd.f32 %v1038_v37, %v1015_v47 }
 0x1bc   :  { %v868_v18 = vrot.slane %v867_v36, 4  ;;  %v924_v19 = vrot.slane %v923_v10, 4  ;;  %v1246_v20 = vmax.f32 %v1203_v13, %v1226_v11  ;;  %v1302_v21 = vadd.f32 %v1226_v11, %v1203_v13  ;;  %v583_v22 = vpop.f32.mrb[6].mxu0  ;;  %v1760_v23 = vpop.f32.mrb[4].mxu1 }
 0x1bd   :  { %v1242_v24 = vrot.slane %v1241_v15, 2  ;;  %v1298_v25 = vrot.slane %v1297_v7, 2  ;;  %v1054_v62 = vrot.slane %v1053_v16, 4  ;;  %v1110_v31 = vrot.slane %v1109_v17, 4  ;;  %v585_v63 = vpop.f32.mrb[7].mxu0  ;;  %v2578_v26 = vpop.f32.mrb[5].mxu1 }
 0x1be   :  { %v869_v32 = vmax.f32 %v867_v36, %v868_v18  ;;  %v925_v27 = vadd.f32 %v924_v19, %v923_v10  ;;  %v1247_v33 = vrot.slane %v1246_v20, 4  ;;  %v1303_v53 = vrot.slane %v1302_v21, 4 }
 0x1bf   :  { %v1243_v34 = vmax.f32 %v1241_v15, %v1242_v24  ;;  %v1299_v35 = vadd.f32 %v1298_v25, %v1297_v7  ;;  %v1055_v38 = vmax.f32 %v1053_v16, %v1054_v62  ;;  %v1111_v39 = vadd.f32 %v1110_v31, %v1109_v17 }
 0x1c0   :  { %v870_v0 = vrot.slane %v869_v32, 2  ;;  %v926_v40 = vrot.slane %v925_v27, 2  ;;  %v1248_v50 = vmax.f32 %v1246_v20, %v1247_v33  ;;  %v1304_v41 = vadd.f32 %v1303_v53, %v1302_v21  ;;  %v589_v51 = vpop.f32.mrb[8].mxu0 }
 0x1c1   :  { %v1244_v42 = vrot.slane %v1243_v34, 1  ;;  %v1300_v44 = vrot.slane %v1299_v35, 1  ;;  %v1056_v45 = vrot.slane %v1055_v38, 2  ;;  %v1112_v46 = vrot.slane %v1111_v39, 2  ;;  %v591_v47 = vpop.f32.mrb[9].mxu0  ;;  %v1763_v48 = vpop.f32.mrb[6].mxu1 }
 0x1c2   :  { %v871_v49 = vmax.f32 %v869_v32, %v870_v0  ;;  %v927_v52 = vadd.f32 %v926_v40, %v925_v27  ;;  %v1249_v54 = vrot.slane %v1248_v50, 2  ;;  %v1305_v55 = vrot.slane %v1304_v41, 2  ;;  %v2580_v56 = vpop.f32.mrb[7].mxu1 }
 0x1c3   :  { %v1245_v57 = vmax.f32 %v1243_v34, %v1244_v42  ;;  %v1301_v58 = vadd.f32 %v1300_v44, %v1299_v35  ;;  %v1057_v59 = vmax.f32 %v1055_v38, %v1056_v45  ;;  %v1113_v12 = vadd.f32 %v1112_v46, %v1111_v39 }
 0x1c4   :  { %v872_v1 = vrot.slane %v871_v49, 1  ;;  %v928_v14 = vrot.slane %v927_v52, 1  ;;  %v1250_v60 = vmax.f32 %v1248_v50, %v1249_v54  ;;  %v1306_v2 = vadd.f32 %v1305_v55, %v1304_v41  ;;  %v2582_v3 = vpop.f32.mrb[10].mxu0 }
 0x1c5   :  { %v1351_v4 = vmul.f32 0.07692308, %v1301_v58  ;;  %v1058_v5 = vrot.slane %v1057_v59, 1  ;;  %v1114_v8 = vrot.slane %v1113_v12, 1  ;;  %v815_v6 = vadd.f32 %v2547_v43, %v2568_v61  ;;  %v2586_v13 = vpop.f32.mrb[11].mxu0 }
 0x1c6   :  { %v873_v36 = vmax.f32 %v871_v49, %v872_v1  ;;  %v929_v10 = vadd.f32 %v928_v14, %v927_v52  ;;  %v1251_v37 = vrot.slane %v1250_v60, 1  ;;  %v1307_v11 = vrot.slane %v1306_v2, 1 }
 0x1c7   :  { %v1359_v15 = vadd.f32 %v1351_v4, %v1245_v57  ;;  %v1059_v7 = vmax.f32 %v1057_v59, %v1058_v5  ;;  %v1115_v16 = vadd.f32 %v1114_v8, %v1113_v12  ;;  %v831_v17 = vmax.f32 %v815_v6, 0.0 }
 0x1c8   :  { %v979_v18 = vmul.f32 0.06666667, %v929_v10  ;;  %v1252_v19 = vmax.f32 %v1250_v60, %v1251_v37  ;;  %v1308_v20 = vadd.f32 %v1307_v11, %v1306_v2  ;;  %v1001_v21 = vadd.f32 %v2549_v28, %v2572_v9  ;;  %v2590_v24 = vpop.f32.mrb[12].mxu0  ;;  %v2592_v25 = vpop.f32.mrb[8].mxu1 }
 0x1c9   :  { %v1165_v61 = vmul.f32 0.071428575, %v1115_v16  ;;  %v816_v62 = vadd.f32 %v2547_v43, %v583_v22  ;;  %v1190_v31 = vadd.f32 %v1760_v23, %v2551_v29  ;;  %v1002_v32 = vadd.f32 %v2549_v28, %v585_v63  ;;  %v2597_v27 = vpop.f32.mrb[13].mxu0  ;;  %v2599_v33 = vpop.f32.mrb[9].mxu1 }
 0x1ca   :  { %v2601_v53 = vadd.f32 %v979_v18, %v873_v36  ;;  %v1352_v34 = vmul.f32 0.07692308, %v1308_v20  ;;  %v1017_v35 = vmax.f32 %v1001_v21, 0.0  ;;  %v1189_v9 = vadd.f32 %v2551_v29, %v2578_v26 }
 0x1cb   :  { %v2605_v38 = vadd.f32 %v1165_v61, %v1059_v7  ;;  %v832_v39 = vmax.f32 %v816_v62, 0.0  ;;  %v1206_v0 = vmax.f32 %v1190_v31, 0.0  ;;  %v1018_v22 = vmax.f32 %v1002_v32, 0.0 }
 0x1cc   :  { %v1360_v40 = vadd.f32 %v1352_v34, %v1252_v19  ;;  %v1205_v23 = vmax.f32 %v1189_v9, 0.0  ;;  %v2608_v63 = vadd.f32 %v2547_v43, %v589_v51  ;;  %v2611_v50 = vadd.f32 %v2549_v28, %v591_v47  ;;  %v2613_v41 = vpop.f32.mrb[14].mxu0 }
 0x1cd   :  { %v854_v42 = vsel %vm846_vm8, %v832_v39, 0.0  ;;  %v1228_v26 = vsel %vm1218_vm7, %v1206_v0, 0.0  ;;  %v1040_v44 = vsel %vm1032_vm9, %v1018_v22, 0.0  ;;  %v1192_v45 = vadd.f32 %v1763_v48, %v2551_v29  ;;  %v2622_v46 = vpop.f32.mrb[15].mxu0  ;;  %v2624_v51 = vpop.f32.mrb[10].mxu1 }
 0x1ce   :  { %v2627_v47 = vsel %vm1375_vm10, %v1360_v40, %v1359_v15  ;;  %v874_v49 = vmax.f32 %v831_v17, %v854_v42  ;;  %v930_v52 = vadd.f32 %v854_v42, %v831_v17  ;;  %v1060_v54 = vmax.f32 %v1017_v35, %v1040_v44  ;;  %v2629_v55 = vpop.f32.mrb[11].mxu1 }
 0x1cf   :  { %v1116_v57 = vadd.f32 %v1040_v44, %v1017_v35  ;;  %v1253_v58 = vmax.f32 %v1205_v23, %v1228_v26  ;;  %v1309_v59 = vadd.f32 %v1228_v26, %v1205_v23  ;;  %v833_v12 = vmax.f32 %v2608_v63, 0.0 }
 0x1d0   :  { %v875_v1 = vrot.slane %v874_v49, 4  ;;  %v931_v14 = vrot.slane %v930_v52, 4  ;;  %v1061_v48 = vrot.slane %v1060_v54, 4  ;;  %v1019_v60 = vmax.f32 %v2611_v50, 0.0  ;;  %v2633_v2 = vpop.f32.mrb[16].mxu0 }
 0x1d1   :  { %v1117_v4 = vrot.slane %v1116_v57, 4  ;;  %v1254_v5 = vrot.slane %v1253_v58, 4  ;;  %v1310_v8 = vrot.slane %v1309_v59, 4  ;;  %v1208_v6 = vmax.f32 %v1192_v45, 0.0  ;;  %v2635_v36 = vpop.f32.mrb[17].mxu0 }
 0x1d2   :  { %v876_v10 = vmax.f32 %v874_v49, %v875_v1  ;;  %v932_v37 = vadd.f32 %v931_v14, %v930_v52  ;;  %v1062_v11 = vmax.f32 %v1060_v54, %v1061_v48  ;;  %v1191_v15 = vadd.f32 %v2551_v29, %v2580_v56 }
 0x1d3   :  { %v1118_v7 = vadd.f32 %v1117_v4, %v1116_v57  ;;  %v1255_v16 = vmax.f32 %v1253_v58, %v1254_v5  ;;  %v1311_v17 = vadd.f32 %v1310_v8, %v1309_v59  ;;  %v1230_v18 = vsel %vm1218_vm7, %v1208_v6, 0.0 }
 0x1d4   :  { %v877_v19 = vrot.slane %v876_v10, 2  ;;  %v933_v20 = vrot.slane %v932_v37, 2  ;;  %v1063_v21 = vrot.slane %v1062_v11, 2  ;;  %v1207_v61 = vmax.f32 %v1191_v15, 0.0  ;;  %v2641_v62 = vpop.f32.mrb[18].mxu0  ;;  %v2643_v31 = vpop.f32.mrb[12].mxu1 }
 0x1d5   :  { %v1119_v32 = vrot.slane %v1118_v7, 2  ;;  %v1256_v34 = vrot.slane %v1255_v16, 2  ;;  %v1312_v35 = vrot.slane %v1311_v17, 2  ;;  %v818_v56 = vadd.f32 %v2547_v43, %v2582_v3  ;;  %v2647_v9 = vpop.f32.mrb[19].mxu0  ;;  %v2649_v39 = vpop.f32.mrb[13].mxu1 }
 0x1d6   :  { %v878_v0 = vmax.f32 %v876_v10, %v877_v19  ;;  %v934_v22 = vadd.f32 %v933_v20, %v932_v37  ;;  %v1064_v40 = vmax.f32 %v1062_v11, %v1063_v21  ;;  %v1260_v23 = vmax.f32 %v1207_v61, %v1230_v18 }
 0x1d7   :  { %v1120_v42 = vadd.f32 %v1119_v32, %v1118_v7  ;;  %v1257_v26 = vmax.f32 %v1255_v16, %v1256_v34  ;;  %v1313_v44 = vadd.f32 %v1312_v35, %v1311_v17  ;;  %v1316_v45 = vadd.f32 %v1230_v18, %v1207_v61 }
 0x1d8   :  { %v879_v49 = vrot.slane %v878_v0, 1  ;;  %v935_v52 = vrot.slane %v934_v22, 1  ;;  %v1065_v54 = vrot.slane %v1064_v40, 1  ;;  %v1261_v57 = vrot.slane %v1260_v23, 4  ;;  %v2651_v58 = vpop.f32.mrb[20].mxu0 }
 0x1d9   :  { %v1121_v3 = vrot.slane %v1120_v42, 1  ;;  %v1258_v59 = vrot.slane %v1257_v26, 1  ;;  %v1314_v1 = vrot.slane %v1313_v44, 1  ;;  %v1317_v14 = vrot.slane %v1316_v45, 4  ;;  %v2653_v48 = vpop.f32.mrb[21].mxu0 }
 0x1da   :  { %v880_v4 = vmax.f32 %v878_v0, %v879_v49  ;;  %v936_v5 = vadd.f32 %v935_v52, %v934_v22  ;;  %v1066_v8 = vmax.f32 %v1064_v40, %v1065_v54  ;;  %v1262_v6 = vmax.f32 %v1260_v23, %v1261_v57 }
 0x1db   :  { %v1122_v10 = vadd.f32 %v1121_v3, %v1120_v42  ;;  %v1259_v37 = vmax.f32 %v1257_v26, %v1258_v59  ;;  %v1315_v11 = vadd.f32 %v1314_v1, %v1313_v44  ;;  %v1318_v15 = vadd.f32 %v1317_v14, %v1316_v45 }
 0x1dc   :  { %v980_v7 = vmul.f32 0.06666667, %v936_v5  ;;  %v1263_v16 = vrot.slane %v1262_v6, 2  ;;  %v834_v17 = vmax.f32 %v818_v56, 0.0  ;;  %v1004_v18 = vadd.f32 %v2549_v28, %v2586_v13  ;;  %v2657_v19 = vpop.f32.mrb[22].mxu0 }
 0x1dd   :  { %v1166_v20 = vmul.f32 0.071428575, %v1122_v10  ;;  %v1353_v21 = vmul.f32 0.07692308, %v1315_v11  ;;  %v1319_v61 = vrot.slane %v1318_v15, 2  ;;  %v2661_v32 = vadd.f32 %v2547_v43, %v2590_v24  ;;  %v2663_v34 = vpop.f32.mrb[23].mxu0 }
 0x1de   :  { %v988_v35 = vadd.f32 %v980_v7, %v880_v4  ;;  %v1264_v0 = vmax.f32 %v1262_v6, %v1263_v16  ;;  %v856_v22 = vsel %vm846_vm8, %v834_v17, 0.0  ;;  %v1020_v56 = vmax.f32 %v1004_v18, 0.0  ;;  %v2667_v40 = vpop.f32.mrb[14].mxu1 }
 0x1df   :  { %v2669_v13 = vadd.f32 %v1166_v20, %v1066_v8  ;;  %v1361_v23 = vadd.f32 %v1353_v21, %v1259_v37  ;;  %v1320_v42 = vadd.f32 %v1319_v61, %v1318_v15  ;;  %v881_v26 = vmax.f32 %v833_v12, %v856_v22  ;;  %v2673_v44 = vpop.f32.mrb[15].mxu1 }
 0x1e0   :  { %v2677_v24 = vsel %vm1375_vm10, %v988_v35, %v2601_v53  ;;  %v1265_v45 = vrot.slane %v1264_v0, 1  ;;  %v937_v49 = vadd.f32 %v856_v22, %v833_v12  ;;  %v1042_v52 = vsel %vm1032_vm9, %v1020_v56, 0.0  ;;  %v2683_v54 = vpop.f32.mrb[24].mxu0 }
 0x1e1   :  { %v2687_v57 = vsel %vm1377_vm11, %v1361_v23, %v2627_v47  ;;  %v1321_v3 = vrot.slane %v1320_v42, 1  ;;  %v882_v59 = vrot.slane %v881_v26, 4  ;;  %v1067_v1 = vmax.f32 %v1019_v60, %v1042_v52  ;;  %v2691_v53 = vpop.f32.mrb[25].mxu0 }
 0x1e2   :  { %v1266_v14 = vmax.f32 %v1264_v0, %v1265_v45  ;;  %v938_v4 = vrot.slane %v937_v49, 4  ;;  %v1123_v63 = vadd.f32 %v1042_v52, %v1019_v60  ;;  %v835_v12 = vmax.f32 %v2661_v32, 0.0 }
 0x1e3   :  { %v1322_v5 = vadd.f32 %v1321_v3, %v1320_v42  ;;  %v883_v8 = vmax.f32 %v881_v26, %v882_v59  ;;  %v1068_v6 = vrot.slane %v1067_v1, 4  ;;  %v1194_v47 = vadd.f32 %v2592_v25, %v2551_v29 }
 0x1e4   :  { %v939_v10 = vadd.f32 %v938_v4, %v937_v49  ;;  %v1124_v37 = vrot.slane %v1123_v63, 4  ;;  %v1005_v11 = vadd.f32 %v2549_v28, %v2597_v27  ;;  %v1193_v15 = vadd.f32 %v2551_v29, %v2599_v33  ;;  %v2702_v7 = vpop.f32.mrb[26].mxu0 }
 0x1e5   :  { %v1354_v50 = vmul.f32 0.07692308, %v1322_v5  ;;  %v884_v60 = vrot.slane %v883_v8, 2  ;;  %v1069_v16 = vmax.f32 %v1067_v1, %v1068_v6  ;;  %v1210_v17 = vmax.f32 %v1194_v47, 0.0  ;;  %v2704_v18 = vpop.f32.mrb[27].mxu0 }
 0x1e6   :  { %v940_v20 = vrot.slane %v939_v10, 2  ;;  %v1125_v21 = vadd.f32 %v1124_v37, %v1123_v63  ;;  %v1021_v61 = vmax.f32 %v1005_v11, 0.0  ;;  %v1209_v25 = vmax.f32 %v1193_v15, 0.0 }
 0x1e7   :  { %v2706_v32 = vadd.f32 %v1354_v50, %v1266_v14  ;;  %v885_v35 = vmax.f32 %v883_v8, %v884_v60  ;;  %v1070_v0 = vrot.slane %v1069_v16, 2  ;;  %v1232_v27 = vsel %vm1218_vm7, %v1210_v17, 0.0 }
 0x1e8   :  { %v941_v33 = vadd.f32 %v940_v20, %v939_v10  ;;  %v1126_v22 = vrot.slane %v1125_v21, 2  ;;  %v1267_v56 = vmax.f32 %v1209_v25, %v1232_v27  ;;  %v1323_v23 = vadd.f32 %v1232_v27, %v1209_v25  ;;  %v2710_v42 = vpop.f32.mrb[28].mxu0 }
 0x1e9   :  { %v886_v26 = vrot.slane %v885_v35, 1  ;;  %v1071_v45 = vmax.f32 %v1069_v16, %v1070_v0  ;;  %v820_v49 = vadd.f32 %v2547_v43, %v2613_v41  ;;  %v1006_v52 = vadd.f32 %v2549_v28, %v2622_v46  ;;  %v2716_v3 = vpop.f32.mrb[29].mxu0 }
 0x1ea   :  { %v942_v59 = vrot.slane %v941_v33, 1  ;;  %v1127_v1 = vadd.f32 %v1126_v22, %v1125_v21  ;;  %v1268_v14 = vrot.slane %v1267_v56, 4  ;;  %v1324_v4 = vrot.slane %v1323_v23, 4 }
 0x1eb   :  { %v887_v63 = vmax.f32 %v885_v35, %v886_v26  ;;  %v1072_v5 = vrot.slane %v1071_v45, 1  ;;  %v836_v8 = vmax.f32 %v820_v49, 0.0  ;;  %v1022_v6 = vmax.f32 %v1006_v52, 0.0 }
 0x1ec   :  { %v943_v47 = vadd.f32 %v942_v59, %v941_v33  ;;  %v1128_v10 = vrot.slane %v1127_v1, 1  ;;  %v1269_v37 = vmax.f32 %v1267_v56, %v1268_v14  ;;  %v1325_v11 = vadd.f32 %v1324_v4, %v1323_v23  ;;  %v2718_v15 = vpop.f32.mrb[30].mxu0 }
 0x1ed   :  { %v1073_v41 = vmax.f32 %v1071_v45, %v1072_v5  ;;  %v858_v46 = vsel %vm846_vm8, %v836_v8, 0.0  ;;  %v1044_v50 = vsel %vm1032_vm9, %v1022_v6, 0.0  ;;  %v1196_v60 = vadd.f32 %v2624_v51, %v2551_v29  ;;  %v2726_v16 = vpop.f32.mrb[31].mxu0 }
 0x1ee   :  { %v981_v17 = vmul.f32 0.06666667, %v943_v47  ;;  %v1129_v20 = vadd.f32 %v1128_v10, %v1127_v1  ;;  %v1270_v21 = vrot.slane %v1269_v37, 2  ;;  %v1326_v25 = vrot.slane %v1325_v11, 2 }
 0x1ef   :  { %v888_v35 = vmax.f32 %v835_v12, %v858_v46  ;;  %v944_v0 = vadd.f32 %v858_v46, %v835_v12  ;;  %v1074_v27 = vmax.f32 %v1021_v61, %v1044_v50  ;;  %v1130_v33 = vadd.f32 %v1044_v50, %v1021_v61 }
 0x1f0   :  { %v989_v22 = vadd.f32 %v981_v17, %v887_v63  ;;  %v1167_v56 = vmul.f32 0.071428575, %v1129_v20  ;;  %v1271_v23 = vmax.f32 %v1269_v37, %v1270_v21  ;;  %v1327_v26 = vadd.f32 %v1326_v25, %v1325_v11 }
 0x1f1   :  { %v889_v45 = vrot.slane %v888_v35, 4  ;;  %v945_v49 = vrot.slane %v944_v0, 4  ;;  %v1075_v52 = vrot.slane %v1074_v27, 4  ;;  %v1131_v59 = vrot.slane %v1130_v33, 4 }
 0x1f2   :  { %v2730_v51 = vsel %vm1377_vm11, %v989_v22, %v2677_v24  ;;  %v2732_v14 = vadd.f32 %v1167_v56, %v1073_v41  ;;  %v1272_v1 = vrot.slane %v1271_v23, 1  ;;  %v1328_v4 = vrot.slane %v1327_v26, 1 }
 0x1f3   :  { %v890_v5 = vmax.f32 %v888_v35, %v889_v45  ;;  %v946_v12 = vadd.f32 %v945_v49, %v944_v0  ;;  %v1076_v8 = vmax.f32 %v1074_v27, %v1075_v52  ;;  %v1132_v61 = vadd.f32 %v1131_v59, %v1130_v33 }
 0x1f4   :  { %v1273_v63 = vmax.f32 %v1271_v23, %v1272_v1  ;;  %v1329_v6 = vadd.f32 %v1328_v4, %v1327_v26  ;;  %v1212_v47 = vmax.f32 %v1196_v60, 0.0  ;;  %v1195_v10 = vadd.f32 %v2551_v29, %v2629_v55 }
 0x1f5   :  { %v891_v37 = vrot.slane %v890_v5, 2  ;;  %v947_v11 = vrot.slane %v946_v12, 2  ;;  %v1077_v46 = vrot.slane %v1076_v8, 2  ;;  %v1133_v50 = vrot.slane %v1132_v61, 2 }
 0x1f6   :  { %v1355_v24 = vmul.f32 0.07692308, %v1329_v6  ;;  %v1234_v41 = vsel %vm1218_vm7, %v1212_v47, 0.0  ;;  %v1211_v17 = vmax.f32 %v1195_v10, 0.0  ;;  %v821_v20 = vadd.f32 %v2547_v43, %v2633_v2 }
 0x1f7   :  { %v892_v21 = vmax.f32 %v890_v5, %v891_v37  ;;  %v948_v25 = vadd.f32 %v947_v11, %v946_v12  ;;  %v1078_v35 = vmax.f32 %v1076_v8, %v1077_v46  ;;  %v1134_v0 = vadd.f32 %v1133_v50, %v1132_v61 }
 0x1f8   :  { %v2740_v60 = vadd.f32 %v1355_v24, %v1273_v63  ;;  %v1274_v27 = vmax.f32 %v1211_v17, %v1234_v41  ;;  %v1330_v55 = vadd.f32 %v1234_v41, %v1211_v17  ;;  %v837_v33 = vmax.f32 %v821_v20, 0.0 }
 0x1f9   :  { %v893_v22 = vrot.slane %v892_v21, 1  ;;  %v949_v56 = vrot.slane %v948_v25, 1  ;;  %v1079_v23 = vrot.slane %v1078_v35, 1  ;;  %v1135_v26 = vrot.slane %v1134_v0, 1 }
 0x1fa   :  { %v1275_v45 = vrot.slane %v1274_v27, 4  ;;  %v1331_v49 = vrot.slane %v1330_v55, 4  ;;  %v1007_v52 = vadd.f32 %v2549_v28, %v2635_v36  ;;  %v822_v2 = vadd.f32 %v2547_v43, %v2641_v62 }
 0x1fb   :  { %v894_v59 = vmax.f32 %v892_v21, %v893_v22  ;;  %v950_v1 = vadd.f32 %v949_v56, %v948_v25  ;;  %v1080_v4 = vmax.f32 %v1078_v35, %v1079_v23  ;;  %v1136_v5 = vadd.f32 %v1135_v26, %v1134_v0 }
 0x1fc   :  { %v1276_v12 = vmax.f32 %v1274_v27, %v1275_v45  ;;  %v1332_v8 = vadd.f32 %v1331_v49, %v1330_v55  ;;  %v1023_v61 = vmax.f32 %v1007_v52, 0.0  ;;  %v838_v63 = vmax.f32 %v822_v2, 0.0 }
 0x1fd   :  { %v982_v6 = vmul.f32 0.06666667, %v950_v1  ;;  %v1168_v47 = vmul.f32 0.071428575, %v1136_v5  ;;  %v1198_v10 = vadd.f32 %v2643_v31, %v2551_v29  ;;  %v1008_v37 = vadd.f32 %v2549_v28, %v2647_v9 }
 0x1fe   :  { %v1277_v36 = vrot.slane %v1276_v12, 2  ;;  %v1333_v11 = vrot.slane %v1332_v8, 2  ;;  %v860_v62 = vsel %vm846_vm8, %v838_v63, 0.0  ;;  %v1197_v46 = vadd.f32 %v2551_v29, %v2649_v39 }
 0x1ff   :  { %v2754_v50 = vadd.f32 %v982_v6, %v894_v59  ;;  %v2756_v24 = vadd.f32 %v1168_v47, %v1080_v4  ;;  %v895_v41 = vmax.f32 %v837_v33, %v860_v62  ;;  %v951_v17 = vadd.f32 %v860_v62, %v837_v33 }
 0x200   :  { %v1278_v20 = vmax.f32 %v1276_v12, %v1277_v36  ;;  %v1334_v21 = vadd.f32 %v1333_v11, %v1332_v8  ;;  %v1214_v31 = vmax.f32 %v1198_v10, 0.0  ;;  %v1024_v25 = vmax.f32 %v1008_v37, 0.0 }
 0x201   :  { %v896_v35 = vrot.slane %v895_v41, 4  ;;  %v952_v9 = vrot.slane %v951_v17, 4  ;;  %v1213_v0 = vmax.f32 %v1197_v46, 0.0  ;;  %v823_v27 = vadd.f32 %v2547_v43, %v2651_v58 }
 0x202   :  { %v1279_v55 = vrot.slane %v1278_v20, 1  ;;  %v1335_v22 = vrot.slane %v1334_v21, 1  ;;  %v1236_v39 = vsel %vm1218_vm7, %v1214_v31, 0.0  ;;  %v1046_v56 = vsel %vm1032_vm9, %v1024_v25, 0.0 }
 0x203   :  { %v897_v23 = vmax.f32 %v895_v41, %v896_v35  ;;  %v953_v33 = vadd.f32 %v952_v9, %v951_v17  ;;  %v1081_v26 = vmax.f32 %v1023_v61, %v1046_v56  ;;  %v1137_v45 = vadd.f32 %v1046_v56, %v1023_v61 }
 0x204   :  { %v1280_v49 = vmax.f32 %v1278_v20, %v1279_v55  ;;  %v1336_v52 = vadd.f32 %v1335_v22, %v1334_v21  ;;  %v1281_v2 = vmax.f32 %v1213_v0, %v1236_v39  ;;  %v1337_v59 = vadd.f32 %v1236_v39, %v1213_v0 }
 0x205   :  { %v898_v1 = vrot.slane %v897_v23, 2  ;;  %v954_v4 = vrot.slane %v953_v33, 2  ;;  %v1082_v5 = vrot.slane %v1081_v26, 4  ;;  %v1138_v58 = vrot.slane %v1137_v45, 4 }
 0x206   :  { %v1356_v12 = vmul.f32 0.07692308, %v1336_v52  ;;  %v1282_v8 = vrot.slane %v1281_v2, 4  ;;  %v1338_v63 = vrot.slane %v1337_v59, 4  ;;  %v839_v6 = vmax.f32 %v823_v27, 0.0 }
 0x207   :  { %v899_v47 = vmax.f32 %v897_v23, %v898_v1  ;;  %v955_v10 = vadd.f32 %v954_v4, %v953_v33  ;;  %v1083_v37 = vmax.f32 %v1081_v26, %v1082_v5  ;;  %v1139_v36 = vadd.f32 %v1138_v58, %v1137_v45 }
 0x208   :  { %v2764_v11 = vadd.f32 %v1356_v12, %v1280_v49  ;;  %v1283_v62 = vmax.f32 %v1281_v2, %v1282_v8  ;;  %v1339_v61 = vadd.f32 %v1338_v63, %v1337_v59  ;;  %v1009_v46 = vadd.f32 %v2549_v28, %v2653_v48 }
 0x209   :  { %v900_v41 = vrot.slane %v899_v47, 1  ;;  %v956_v17 = vrot.slane %v955_v10, 1  ;;  %v1084_v20 = vrot.slane %v1083_v37, 2  ;;  %v1140_v21 = vrot.slane %v1139_v36, 2 }
 0x20a   :  { %v1284_v31 = vrot.slane %v1283_v62, 2  ;;  %v1340_v25 = vrot.slane %v1339_v61, 2  ;;  %v1025_v35 = vmax.f32 %v1009_v46, 0.0  ;;  %v824_v9 = vadd.f32 %v2547_v43, %v2657_v19 }
 0x20b   :  { %v901_v0 = vmax.f32 %v899_v47, %v900_v41  ;;  %v957_v27 = vadd.f32 %v956_v17, %v955_v10  ;;  %v1085_v55 = vmax.f32 %v1083_v37, %v1084_v20  ;;  %v1141_v22 = vadd.f32 %v1140_v21, %v1139_v36 }
 0x20c   :  { %v1285_v39 = vmax.f32 %v1283_v62, %v1284_v31  ;;  %v1341_v56 = vadd.f32 %v1340_v25, %v1339_v61  ;;  %v840_v23 = vmax.f32 %v824_v9, 0.0  ;;  %v1010_v48 = vadd.f32 %v2549_v28, %v2663_v34 }
 0x20d   :  { %v983_v33 = vmul.f32 0.06666667, %v957_v27  ;;  %v1086_v26 = vrot.slane %v1085_v55, 1  ;;  %v1142_v45 = vrot.slane %v1141_v22, 1  ;;  %v1200_v49 = vadd.f32 %v2667_v40, %v2551_v29 }
 0x20e   :  { %v1286_v52 = vrot.slane %v1285_v39, 1  ;;  %v1342_v2 = vrot.slane %v1341_v56, 1  ;;  %v862_v19 = vsel %vm846_vm8, %v840_v23, 0.0  ;;  %v1026_v59 = vmax.f32 %v1010_v48, 0.0 }
 0x20f   :  { %v2776_v1 = vadd.f32 %v983_v33, %v901_v0  ;;  %v1087_v4 = vmax.f32 %v1085_v55, %v1086_v26  ;;  %v1143_v5 = vadd.f32 %v1142_v45, %v1141_v22  ;;  %v902_v58 = vmax.f32 %v839_v6, %v862_v19 }
 0x210   :  { %v1287_v12 = vmax.f32 %v1285_v39, %v1286_v52  ;;  %v1343_v8 = vadd.f32 %v1342_v2, %v1341_v56  ;;  %v958_v34 = vadd.f32 %v862_v19, %v839_v6  ;;  %v1048_v63 = vsel %vm1032_vm9, %v1026_v59, 0.0 }
 0x211   :  { %v1169_v47 = vmul.f32 0.071428575, %v1143_v5  ;;  %v903_v10 = vrot.slane %v902_v58, 4  ;;  %v1088_v40 = vmax.f32 %v1025_v35, %v1048_v63  ;;  %v1144_v37 = vadd.f32 %v1048_v63, %v1025_v35 }
 0x212   :  { %v1357_v36 = vmul.f32 0.07692308, %v1343_v8  ;;  %v959_v62 = vrot.slane %v958_v34, 4  ;;  %v1216_v61 = vmax.f32 %v1200_v49, 0.0  ;;  %v1199_v46 = vadd.f32 %v2551_v29, %v2673_v44 }
 0x213   :  { %v2782_v41 = vadd.f32 %v1169_v47, %v1087_v4  ;;  %v904_v17 = vmax.f32 %v902_v58, %v903_v10  ;;  %v1089_v20 = vrot.slane %v1088_v40, 4  ;;  %v1145_v21 = vrot.slane %v1144_v37, 4 }
 0x214   :  { %v2784_v31 = vadd.f32 %v1357_v36, %v1287_v12  ;;  %v960_v6 = vadd.f32 %v959_v62, %v958_v34  ;;  %v1238_v25 = vsel %vm1218_vm7, %v1216_v61, 0.0  ;;  %v1215_v9 = vmax.f32 %v1199_v46, 0.0 }
 0x215   :  { %v905_v0 = vrot.slane %v904_v17, 2  ;;  %v1090_v35 = vmax.f32 %v1088_v40, %v1089_v20  ;;  %v1146_v27 = vadd.f32 %v1145_v21, %v1144_v37  ;;  %v825_v55 = vadd.f32 %v2547_v43, %v2683_v54 }
 0x216   :  { %v961_v22 = vrot.slane %v960_v6, 2  ;;  %v1288_v29 = vmax.f32 %v1215_v9, %v1238_v25  ;;  %v1344_v44 = vadd.f32 %v1238_v25, %v1215_v9  ;;  %v1011_v48 = vadd.f32 %v2549_v28, %v2691_v53 }
 0x217   :  { %v906_v39 = vmax.f32 %v904_v17, %v905_v0  ;;  %v1091_v56 = vrot.slane %v1090_v35, 2  ;;  %v1147_v23 = vrot.slane %v1146_v27, 2  ;;  %v841_v49 = vmax.f32 %v825_v55, 0.0 }
 0x218   :  { %v962_v33 = vadd.f32 %v961_v22, %v960_v6  ;;  %v1289_v26 = vrot.slane %v1288_v29, 4  ;;  %v1345_v45 = vrot.slane %v1344_v44, 4  ;;  %v826_v59 = vadd.f32 %v2547_v43, %v2702_v7 }
 0x219   :  { %v907_v52 = vrot.slane %v906_v39, 1  ;;  %v1092_v2 = vmax.f32 %v1090_v35, %v1091_v56  ;;  %v1148_v19 = vadd.f32 %v1147_v23, %v1146_v27  ;;  %v1012_v58 = vadd.f32 %v2549_v28, %v2704_v18 }
 0x21a   :  { %v963_v54 = vrot.slane %v962_v33, 1  ;;  %v1290_v4 = vmax.f32 %v1288_v29, %v1289_v26  ;;  %v1346_v5 = vadd.f32 %v1345_v45, %v1344_v44  ;;  %v1027_v53 = vmax.f32 %v1011_v48, 0.0 }
 0x21b   :  { %v1093_v12 = vrot.slane %v1092_v2, 1  ;;  %v1149_v8 = vrot.slane %v1148_v19, 1  ;;  %v842_v34 = vmax.f32 %v826_v59, 0.0  ;;  %v1028_v40 = vmax.f32 %v1012_v58, 0.0 }
 0x21c   :  { %v964_v63 = vadd.f32 %v963_v54, %v962_v33  ;;  %v1291_v47 = vrot.slane %v1290_v4, 2  ;;  %v1347_v10 = vrot.slane %v1346_v5, 2  ;;  %v908_v37 = vmax.f32 %v906_v39, %v907_v52 }
 0x21d   :  { %v2796_v36 = vmax.f32 %v1092_v2, %v1093_v12  ;;  %v864_v7 = vsel %vm846_vm8, %v842_v34, 0.0  ;;  %v827_v62 = vadd.f32 %v2547_v43, %v2710_v42  ;;  %v1150_v20 = vadd.f32 %v1149_v8, %v1148_v19 }
 0x21e   :  { %v984_v18 = vmul.f32 0.06666667, %v964_v63  ;;  %v1292_v61 = vmax.f32 %v1290_v4, %v1291_v47  ;;  %v1348_v46 = vadd.f32 %v1347_v10, %v1346_v5  ;;  %v909_v17 = vmax.f32 %v841_v49, %v864_v7 }
 0x21f   :  { %v965_v21 = vadd.f32 %v864_v7, %v841_v49  ;;  %v1050_v6 = vsel %vm1032_vm9, %v1028_v40, 0.0  ;;  %v843_v25 = vmax.f32 %v827_v62, 0.0  ;;  %v1013_v42 = vadd.f32 %v2549_v28, %v2716_v3 }
 0x220   :  { %v2804_v9 = vadd.f32 %v984_v18, %v908_v37  ;;  %v1293_v0 = vrot.slane %v1292_v61, 1  ;;  %v1349_v35 = vrot.slane %v1348_v46, 1  ;;  %v910_v27 = vrot.slane %v909_v17, 4 }
 0x221   :  { %v966_v55 = vrot.slane %v965_v21, 4  ;;  %v1095_v22 = vmax.f32 %v1027_v53, %v1050_v6  ;;  %v1151_v29 = vadd.f32 %v1050_v6, %v1027_v53  ;;  %v828_v23 = vadd.f32 %v2547_v43, %v2718_v15 }
 0x222   :  { %v1294_v44 = vmax.f32 %v1292_v61, %v1293_v0  ;;  %v1350_v39 = vadd.f32 %v1349_v35, %v1348_v46  ;;  %v911_v56 = vmax.f32 %v909_v17, %v910_v27  ;;  %v1029_v45 = vmax.f32 %v1013_v42, 0.0  ;;  %v1432_v35 = vld [vmem:[#allocation8 + $0x50] sm:$0xff]  ;;  %v1450_v27 = vld [vmem:[#allocation8 + $0xe0] sm:$0xff]  ;;  %v1451_v42 = vld [vmem:[#allocation8 + $0xe8] sm:$0xff] }
 0x223   :  { %v967_v48 = vadd.f32 %v966_v55, %v965_v21  ;;  %v1096_v33 = vrot.slane %v1095_v22, 4  ;;  %v1152_v26 = vrot.slane %v1151_v29, 4  ;;  %v844_v2 = vmax.f32 %v828_v23, 0.0 }
 0x224   :  { %v1358_v49 = vmul.f32 0.07692308, %v1350_v39  ;;  %v912_v52 = vrot.slane %v911_v56, 2  ;;  %v1014_v19 = vadd.f32 %v2549_v28, %v2726_v16  ;;  %v1416_v4 = vsel %vm1379_vm12, %v2706_v32, %v2687_v57 }
 0x225   :  { %v968_v3 = vrot.slane %v967_v48, 2  ;;  %v1097_v59 = vmax.f32 %v1095_v22, %v1096_v33  ;;  %v1153_v54 = vadd.f32 %v1152_v26, %v1151_v29  ;;  %v866_v15 = vsel %vm846_vm8, %v844_v2, 0.0  ;;  %v1435_v33 = vld [vmem:[#allocation8 + $0x68] sm:$0xff]  ;;  %v1452_v26 = vld [vmem:[#allocation8 + $0xf0] sm:$0xff] }
 0x226   :  { %v913_v43 = vmax.f32 %v911_v56, %v912_v52  ;;  %v1030_v5 = vmax.f32 %v1014_v19, 0.0  ;;  %v1366_v58 = vadd.f32 %v1358_v49, %v1294_v44  ;;  %v916_v34 = vmax.f32 %v843_v25, %v866_v15  ;;  %v1434_v44 = vld [vmem:[#allocation8 + $0x60] sm:$0xff] }
 0x227   :  { %v969_v12 = vadd.f32 %v968_v3, %v967_v48  ;;  %v1098_v8 = vrot.slane %v1097_v59, 2  ;;  %v1154_v53 = vrot.slane %v1153_v54, 2  ;;  %v972_v28 = vadd.f32 %v866_v15, %v843_v25 }
 0x228   :  { %v914_v63 = vrot.slane %v913_v43, 1  ;;  %v1052_v16 = vsel %vm1032_vm9, %v1030_v5, 0.0  ;;  %v1417_v47 = vsel %vm1381_vm13, %v2740_v60, %v1416_v4  ;;  %v917_v40 = vrot.slane %v916_v34, 4  ;;  %v1433_v60 = vld [vmem:[#allocation8 + $0x58] sm:$0xff] }
 0x229   :  { %v970_v10 = vrot.slane %v969_v12, 1  ;;  %v1099_v57 = vmax.f32 %v1097_v59, %v1098_v8  ;;  %v1155_v32 = vadd.f32 %v1154_v53, %v1153_v54  ;;  %v1170_v37 = vmul.f32 0.071428575, %v1150_v20  ;;  %v1436_v53 = vld [vmem:[#allocation8 + $0x70] sm:$0xff] }
 0x22a   :  { %v973_v7 = vrot.slane %v972_v28, 4  ;;  %v1102_v62 = vmax.f32 %v1029_v45, %v1052_v16  ;;  %v1158_v18 = vadd.f32 %v1052_v16, %v1029_v45  ;;  %v915_v61 = vmax.f32 %v913_v43, %v914_v63  ;;  %v1453_v45 = vld [vmem:[#allocation8 + $0xf8] sm:$0xff] }
 0x22b   :  { %v971_v46 = vadd.f32 %v970_v10, %v969_v12  ;;  %v1156_v17 = vrot.slane %v1155_v32, 1  ;;  %v918_v21 = vmax.f32 %v916_v34, %v917_v40  ;;  %v1418_v30 = vsel %vm1383_vm14, %v2764_v11, %v1417_v47  ;;  %v1437_v34 = vld [vmem:[#allocation8 + $0x78] sm:$0xff] }
 0x22c   :  { %v974_v6 = vadd.f32 %v973_v7, %v972_v28  ;;  %v1103_v25 = vrot.slane %v1102_v62, 4  ;;  %v1159_v0 = vrot.slane %v1158_v18, 4  ;;  %v1100_v22 = vrot.slane %v1099_v57, 1 }
 0x22d   :  { %v985_v55 = vmul.f32 0.06666667, %v971_v46  ;;  %v1157_v29 = vadd.f32 %v1156_v17, %v1155_v32  ;;  %v919_v20 = vrot.slane %v918_v21, 2  ;;  %v1419_v48 = vsel %vm1385_vm15, %v2784_v31, %v1418_v30 }
 0x22e   :  { %v975_v39 = vrot.slane %v974_v6, 2  ;;  %v1104_v56 = vmax.f32 %v1102_v62, %v1103_v25  ;;  %v1160_v23 = vadd.f32 %v1159_v0, %v1158_v18  ;;  %v1420_v52 = vsel %vm1387_vm0, %v1366_v58, %v1419_v48 }
 0x22f   :  { %v993_v49 = vadd.f32 %v985_v55, %v915_v61  ;;  %v920_v11 = vmax.f32 %v918_v21, %v919_v20  ;;  %v1897_v2 = vpack.c.bf16 %v1433_v60, %v1432_v35  ;;  %1809 = vmatmul.mubr.f32.vlgmr.msra.gmra.mrb[32].mxu0 %v1420_v52  ;;  %v1899_v54 = vpack.c.bf16 %v1451_v42, %v1450_v27 }
 0x230   :  { %v976_v19 = vadd.f32 %v975_v39, %v974_v6  ;;  %v1105_v3 = vrot.slane %v1104_v56, 2  ;;  %v1161_v59 = vrot.slane %v1160_v23, 2  ;;  %v1101_v4 = vmax.f32 %v1099_v57, %v1100_v22 }
 0x231   :  { %v921_v43 = vrot.slane %v920_v11, 1  ;;  %1898 = vmatpush3.bf16.msra.mxu1 %v1897_v2  ;;  %v1901_v15 = vpack.c.bf16 %v1435_v33, %v1434_v44  ;;  %v1903_v5 = vpack.c.bf16 %v1453_v45, %v1452_v26  ;;  %v1171_v63 = vmul.f32 0.071428575, %v1157_v29 }
 0x232   :  { %v977_v12 = vrot.slane %v976_v19, 1  ;;  %v1106_v31 = vmax.f32 %v1104_v56, %v1105_v3  ;;  %v1162_v8 = vadd.f32 %v1161_v59, %v1160_v23  ;;  %1900 = vmatprep.subr.bf16.mxu1 %v1899_v54  ;;  %v1178_v58 = vadd.f32 %v1170_v37, %v2796_v36 }
 0x233   :  { %v1398_v28 = vsel %vm1375_vm10, %v2669_v13, %v2605_v38  ;;  %v1380_v16 = vsel %vm1379_vm12, %v2754_v50, %v2730_v51  ;;  %v1179_v32 = vadd.f32 %v1171_v63, %v1101_v4  ;;  %v1905_v40 = vpack.c.bf16 %v1437_v34, %v1436_v53 }
 0x234   :  { %v978_v47 = vadd.f32 %v977_v12, %v976_v19  ;;  %v1107_v10 = vrot.slane %v1106_v31, 1  ;;  %v1163_v57 = vrot.slane %v1162_v8, 1  ;;  %v1399_v7 = vsel %vm1377_vm11, %v2732_v14, %v1398_v28 }
 0x235   :  { %1902 = vmatpush3.bf16.msra.mxu1 %v1901_v15  ;;  %v1382_v36 = vsel %vm1381_vm13, %v2776_v1, %v1380_v16  ;;  %v922_v37 = vmax.f32 %v920_v11, %v921_v43  ;;  %v1400_v13 = vsel %vm1379_vm12, %v2756_v24, %v1399_v7 }
 0x236   :  { %v986_v62 = vmul.f32 0.06666667, %v978_v47  ;;  %1904 = vmatprep.subr.bf16.mxu1 %v1903_v5  ;;  %v1164_v38 = vadd.f32 %v1163_v57, %v1162_v8  ;;  %v1108_v51 = vmax.f32 %v1106_v31, %v1107_v10  ;;  %v1401_v50 = vsel %vm1381_vm13, %v2782_v41, %v1400_v13 }
 0x237   :  { %v1384_v18 = vsel %vm1383_vm14, %v2804_v9, %v1382_v36  ;;  %v1402_v14 = vsel %vm1383_vm14, %v1178_v58, %v1401_v50  ;;  %v1635_v9 = vld [vmem:[#allocation10] ss:$0 sm:$0xff] }
 0x238   :  { %v1172_v61 = vmul.f32 0.071428575, %v1164_v38  ;;  %v994_v46 = vadd.f32 %v986_v62, %v922_v37  ;;  %v1386_v1 = vsel %vm1385_vm15, %v993_v49, %v1384_v18  ;;  %v1403_v17 = vsel %vm1385_vm15, %v1179_v32, %v1402_v14 }
 0x239   :  { %1906 = vmatpush3.bf16.msra.mxu1 %v1905_v40 }
 0x23a   :  { %v1180_v21 = vadd.f32 %v1172_v61, %v1108_v51  ;;  %v1388_v6 = vsel %vm1387_vm0, %v994_v46, %v1386_v1 }
 0x23c   :  { %v1404_v24 = vsel %vm1387_vm0, %v1180_v21, %v1403_v17 }
 0x23d   :  { %1541 = vmatprep.mubr.f32.mxu1 %v1404_v24 }
 0x23e   :  { %1542 = vmatmul.mubr.f32.vlgmr.msra.gmra.mrb[16].mxu1 %v1388_v6 }
 0x302   :  { %v1613_v41 = vpop.f32.mrb[32].mxu0 }
 0x303   :  { %v1810_v25 = vpop.f32.mrb[33].mxu0 }
 0x311   :  { %v1700_v0 = vpop.f32.mrb[16].mxu1 }
 0x312   :  { %v1701_v30 = vpop.f32.mrb[17].mxu1 }
 0x313   :  { %v1702_v35 = vadd.f32 %v1701_v30, %v1700_v0 }
 0x315   :  { %v1544_v60 = vadd.f32 %v1702_v35, %v1635_v9 }
 0x317   :  { %v1614_v27 = vadd.f32 %v1613_v41, %v1544_v60 }
 0x319   :  { %1617 = vst [vmem:[#allocation11] sm:$0xff] %v1614_v27 }
 0x31a   :  { %2173 = shalt.err (!%p2170_p2)
}
 0x31b   :  { %s2174_s9 = scalar_lea.hbm %s2865_s5, 128 }
 0x31c   :  { %p2175_p3 = scmp.ne.s32.totalorder %s2865_s5, %s2174_s9  ;;  %p2178_p4 = scmp.lt.u32.totalorder %s2174_s9, %s2865_s5 }
 0x31e   :  { %p2180_p5 = pnand %p2178_p4, %p2175_p3 }
 0x320   :  { %2183 = shalt.err (!%p2180_p5)
}
 0x321   :  { %1627 = dma.vmem_to_hbm [thread:$0]  %s1625_s30, 128, %s2865_s5, [#allocation4]  }
 0x322   :  { %2190 = dma.done.wait [#allocation4], 128  }
 0x323   :  { %2191 = vsyncadd [#allocation4], 4294967168 }
 0x324   :  { %1631 = vsyncpa [#allocation3], 1 }
 0x325   :  { %1632 = vsyncpa [#allocation6], 1 }
 0x326   :  { %1633 = vsyncpa [#allocation9], 1 }
 0x327   :  { %1634 = vsyncpa [#allocation4], 1 }

</bundles_post_ra>
